<compile_context>
chip_gen: v6e
topology: v6e:2x2x1
jax: 0.10.0
libtpu: 0.0.40
codegen_flags: <defaults>
</compile_context>

<pallas_src>
import functools

import jax
import jax.numpy as jnp
import numpy as np
from jax.experimental import pallas as pl
from jax.experimental.pallas import tpu as pltpu


def _round_up(x, m):
    return ((x + m - 1) // m) * m


def _cdiv(a, b):
    return -(-a // b)


def _vmem_budget_bytes():
    """Return (block_budget, vmem_limit) per TPU generation.

    v5e/v6e have 128 MiB physical VMEM -> use most of it; v7x has only 64 MiB per
    TensorCore -> keep the scoped request well under that."""
    try:
        cap = int(pltpu.get_tpu_info().vmem_capacity_bytes)
    except Exception:
        cap = 64 * 1024 * 1024
    if cap >= 100 * 1024 * 1024:                       # v5e / v6e (128 MiB)
        return 90 * 1024 * 1024, 104 * 1024 * 1024
    return 44 * 1024 * 1024, 56 * 1024 * 1024          # v7x (64 MiB per TC)


def _choose_block_rows(NV, S, T_dec, T_out_p, C_in, C_out_p, in_bytes, out_bytes,
                       K, budget_bytes):
    """Rows of (n, v) pairs per grid step.

    The VMEM budget sets B (no artificial M cap); the grid is kept at >= 4 even
    steps when possible so both v7x TensorCores get >= 2 pipelined steps each."""
    fixed = (K * C_in * C_out_p * in_bytes     # weights (single-buffered)
             + 2 * C_out_p * 4)                # BN scale + bias (single-buffered)
    per_row = (2 * S * T_dec * C_in * in_bytes       # double-buffered input block
               + 2 * T_out_p * C_out_p * out_bytes   # double-buffered output block
               + T_out_p * C_out_p * 4)              # f32 accumulator scratch
    b_mem = max(1, (budget_bytes - fixed) // per_row)

    min_steps = min(NV, 4)
    grid = max(_cdiv(NV, b_mem), min_steps)
    if grid > 1 and grid % 2:
        grid += 1                                    # even split across 2 TCs
    B = max(1, min(b_mem, _cdiv(NV, grid)))
    grid = _cdiv(NV, B)
    if grid > 1 and grid % 2:
        grid += 1
    return int(B), int(grid)


def _tcn_kernel(x_ref, w_ref, scale_ref, bias_ref, o_ref, acc_ref, *,
                K, stride, T_out_p):
    # x_ref:     (B, S, T_dec, C_in)   bf16 phase-decimated, zero-padded input rows
    # w_ref:     (K, C_in, C_out_p)    bf16 conv weights (grid-invariant)
    # scale_ref: (1, C_out_p)          f32 folded BN scale
    # bias_ref:  (1, C_out_p)          f32 folded BN bias (includes conv bias)
    # o_ref:     (B, T_out_p, C_out_p) output block (lane-dense: C_out_p % 128 == 0)
    # acc_ref:   (B*T_out_p, C_out_p)  f32 accumulator scratch
    B = x_ref.shape[0]
    C_in = x_ref.shape[3]
    C_out_p = o_ref.shape[2]

    def tap(k):
        # Output time t consumes x_padded[t*stride + k] == phase[k % stride][t + k//stride],
        # so every tap is a dense, unit-stride sublane slice of the pipelined block.
        xs = x_ref[:, k % stride, pl.ds(k // stride, T_out_p), :]   # (B, T_out_p, C_in)
        xs2 = xs.reshape(B * T_out_p, C_in)     # T_out_p % 16 == 0 -> tile-aligned
        return jnp.dot(xs2, w_ref[k], preferred_element_type=jnp.float32)

    # TODO(synk): per-tap accumulation round-trips the f32 accumulator through VMEM;
    # on v7x this could stay in the MRB (matmul_push_rhs/acc_lhs/pop) and on v6e
    # tap pairs could be packed into the 256-deep contraction when C_in <= 128.
    acc_ref[...] = tap(0)
    for k in range(1, K):                       # static unroll over kernel taps
        acc_ref[...] += tap(k)

    out = acc_ref[...] * scale_ref[...] + bias_ref[...]             # f32 BN epilogue
    o_ref[...] = out.reshape(B, T_out_p, C_out_p).astype(o_ref.dtype)


def unit_tcn_forward(x_nchw, weight, conv_bias, bn_gamma, bn_beta, bn_mean, bn_var,
                     kernel_size=9, stride=1, eps=1e-5, compute_dtype=jnp.bfloat16):
    """x_nchw: (N, C_in, T, V); weight: (C_out, C_in, K, 1) (torch OIHW)."""
    N, C_in, T, V = x_nchw.shape
    C_out = weight.shape[0]
    K = kernel_size
    s = stride
    pad = (K - 1) // 2
    T_out = (T + 2 * pad - K) // s + 1

    # Pad kernel-visible output length to a multiple of 16 so the
    # (B, T_out_p, C) <-> (B*T_out_p, C) reshapes stay tile-aligned (bf16 sublane 16).
    T_out_p = _round_up(T_out, 16)
    # Lane-dense matmul N-dim and output stores: pad C_out to a multiple of 128.
    C_out_p = _round_up(C_out, 128)

    # Phase-decimated, zero-padded time axis (phase r holds x_padded[j*s + r]), so
    # all in-kernel tap reads are unit-stride even for stride > 1.
    Qmax = _cdiv(K, s)
    T_dec = max(T_out_p + Qmax - 1, _cdiv(pad + T, s))
    T_total = T_dec * s

    out_dtype = x_nchw.dtype
    in_bytes = jnp.dtype(compute_dtype).itemsize
    out_bytes = jnp.dtype(out_dtype).itemsize

    NV = N * V
    budget, vmem_limit = _vmem_budget_bytes()
    B, grid = _choose_block_rows(NV, s, T_dec, T_out_p, C_in, C_out_p,
                                 in_bytes, out_bytes, K, budget)
    NV_pad = grid * B

    # ---- wrapper glue (pad + cast + transpose fuse into one XLA pass under jit).
    # TODO(synk): keep activations channels-last between layers to drop the
    # NCHW <-> (N*V, T, C) transposes (a full HBM pass each) entirely.
    x = jnp.transpose(x_nchw, (0, 3, 2, 1)).reshape(NV, T, C_in)
    x = jnp.pad(x, ((0, NV_pad - NV), (pad, T_total - pad - T), (0, 0)))
    x = x.astype(compute_dtype)
    x = x.reshape(NV_pad, T_dec, s, C_in).transpose(0, 2, 1, 3)   # (NV_pad, s, T_dec, C_in)

    w = jnp.transpose(weight[:, :, :, 0], (2, 1, 0)).astype(compute_dtype)  # (K, C_in, C_out)
    w = jnp.pad(w, ((0, 0), (0, 0), (0, C_out_p - C_out)))
    scale = (bn_gamma / jnp.sqrt(bn_var + eps)).astype(jnp.float32)          # (C_out,)
    bias = (bn_beta + scale * (conv_bias - bn_mean)).astype(jnp.float32)     # (C_out,)
    scale = jnp.pad(scale, (0, C_out_p - C_out)).reshape(1, C_out_p)
    bias = jnp.pad(bias, (0, C_out_p - C_out)).reshape(1, C_out_p)

    kern = functools.partial(_tcn_kernel, K=K, stride=s, T_out_p=T_out_p)

    flops = 2 * NV_pad * T_out_p * K * C_in * C_out_p
    bytes_accessed = (x.size * in_bytes + w.size * in_bytes
                      + (scale.size + bias.size) * 4
                      + NV_pad * T_out_p * C_out_p * out_bytes)

    single_buf = dict(pipeline_mode=pl.Buffered(1))   # grid-invariant operands

    out = pl.pallas_call(
        kern,
        out_shape=jax.ShapeDtypeStruct((NV_pad, T_out_p, C_out_p), out_dtype),
        grid_spec=pltpu.PrefetchScalarGridSpec(
            num_scalar_prefetch=0,
            grid=(grid,),
            in_specs=[
                pl.BlockSpec((B, s, T_dec, C_in), lambda i: (i, 0, 0, 0)),
                pl.BlockSpec((K, C_in, C_out_p), lambda i: (0, 0, 0), **single_buf),
                pl.BlockSpec((1, C_out_p), lambda i: (0, 0), **single_buf),
                pl.BlockSpec((1, C_out_p), lambda i: (0, 0), **single_buf),
            ],
            out_specs=pl.BlockSpec((B, T_out_p, C_out_p), lambda i: (i, 0, 0)),
            scratch_shapes=[
                pltpu.VMEM((B * T_out_p, C_out_p), jnp.float32),   # f32 accumulator
            ],
        ),
        compiler_params=pltpu.CompilerParams(
            dimension_semantics=("parallel",),
            vmem_limit_bytes=int(vmem_limit),
        ),
        cost_estimate=pl.CostEstimate(flops=int(flops), transcendentals=0,
                                      bytes_accessed=int(bytes_accessed)),
    )(x, w, scale, bias)

    # Strip padding, back to NCHW: (NV, T_out, C_out) -> (N, C_out, T_out, V).
    out = out[:NV, :T_out, :C_out]
    return out.reshape(N, V, T_out, C_out).transpose(0, 3, 2, 1)


def _reference(x_nchw, weight, conv_bias, gamma, beta, mean, var,
               kernel_size=9, stride=1, eps=1e-5, compute_dtype=jnp.bfloat16):
    """Pure-jnp reference using the same bf16 operand rounding + f32 accumulation."""
    K = kernel_size
    pad = (K - 1) // 2
    T = x_nchw.shape[2]
    T_out = (T + 2 * pad - K) // stride + 1
    xc = x_nchw.astype(compute_dtype).astype(jnp.float32)
    wc = weight[:, :, :, 0].astype(compute_dtype).astype(jnp.float32)   # (C_out, C_in, K)
    xp = jnp.pad(xc, ((0, 0), (0, 0), (pad, pad), (0, 0)))
    y = None
    for k in range(K):
        sl = xp[:, :, k:k + (T_out - 1) * stride + 1:stride, :]         # (N, C_in, T_out, V)
        term = jnp.einsum('nctv,oc->notv', sl, wc[:, :, k])
        y = term if y is None else y + term
    y = y + conv_bias[None, :, None, None]
    y = (y - mean[None, :, None, None]) / jnp.sqrt(var[None, :, None, None] + eps)
    y = y * gamma[None, :, None, None] + beta[None, :, None, None]
    return y.astype(x_nchw.dtype)


def _run_case(key, N, C_in, C_out, T, V, K, stride):
    kx, kw = jax.random.split(key)
    x = jax.random.normal(kx, (N, C_in, T, V), dtype=jnp.float32)

    # Deterministic parameters (kaiming-ish conv weight; non-trivial BN stats so the
    # folded scale/bias epilogue is actually exercised).
    fan_in = C_in * K
    weight = jax.random.normal(kw, (C_out, C_in, K, 1), dtype=jnp.float32) * np.sqrt(2.0 / fan_in)
    idx = jnp.arange(C_out, dtype=jnp.float32)
    conv_bias = 0.01 * idx
    bn_gamma = 1.0 + 0.10 * idx
    bn_beta = 0.05 * idx
    bn_mean = 0.01 * idx
    bn_var = 1.0 + 0.02 * idx

    fwd = jax.jit(functools.partial(unit_tcn_forward, kernel_size=K, stride=stride))
    out = jax.block_until_ready(fwd(x, weight, conv_bias, bn_gamma, bn_beta,
                                    bn_mean, bn_var))
    ref = jax.block_until_ready(_reference(x, weight, conv_bias, bn_gamma, bn_beta,
                                           bn_mean, bn_var, kernel_size=K,
                                           stride=stride))
    assert out.shape == ref.shape, (out.shape, ref.shape)
    np.testing.assert_allclose(np.asarray(out), np.asarray(ref), rtol=2e-4, atol=2e-4)


if __name__ == "__main__":
    key = jax.random.PRNGKey(0)
    k1, k2 = jax.random.split(key)
    _run_case(k1, N=2, C_in=4, C_out=8, T=16, V=16, K=9, stride=1)
    _run_case(k2, N=2, C_in=4, C_out=8, T=16, V=16, K=9, stride=2)
    print("KERNEL_OK")
</pallas_src>

<mosaic_0001>
module attributes {stable_mosaic.version = 11 : i64} {
  func.func @_tcn_kernel(%arg0: i32, %arg1: memref<8x1x24x4xbf16, #tpu.memory_space<vmem>>, %arg2: memref<9x4x128xbf16, #tpu.memory_space<vmem>>, %arg3: memref<1x128xf32, #tpu.memory_space<vmem>>, %arg4: memref<1x128xf32, #tpu.memory_space<vmem>>, %arg5: memref<8x16x128xf32, #tpu.memory_space<vmem>>, %arg6: memref<128x128xf32, #tpu.memory_space<vmem>>) attributes {dimension_semantics = [#tpu.dimension_semantics<parallel>], iteration_bounds = array<i64: 4>, scalar_prefetch = 0 : i64, scratch_operands = 1 : i64, tpu.core_type = #tpu.core_type<tc>, window_params = [{transform_indices = @transform_0, window_bounds = array<i64: 8, 1, 24, 4>}, {pipeline_mode = #tpu.pipeline_mode<synchronous>, transform_indices = @transform_1, window_bounds = array<i64: 9, 4, 128>}, {pipeline_mode = #tpu.pipeline_mode<synchronous>, transform_indices = @transform_2, window_bounds = array<i64: 1, 128>}, {pipeline_mode = #tpu.pipeline_mode<synchronous>, transform_indices = @transform_3, window_bounds = array<i64: 1, 128>}, {transform_indices = @transform_4, window_bounds = array<i64: 8, 16, 128>}]} {
    %c0 = arith.constant 0 : index
    %c0_0 = arith.constant 0 : index
    %c0_1 = arith.constant 0 : index
    %c0_2 = arith.constant 0 : index
    %0 = vector.load %arg1[%c0, %c0_0, %c0_1, %c0_2] : memref<8x1x24x4xbf16, #tpu.memory_space<vmem>>, vector<8x1x16x4xbf16>
    %1 = vector.shape_cast %0 : vector<8x1x16x4xbf16> to vector<8x16x4xbf16>
    %2 = vector.shape_cast %1 : vector<8x16x4xbf16> to vector<128x4xbf16>
    %c0_3 = arith.constant 0 : index
    %c0_4 = arith.constant 0 : index
    %c0_5 = arith.constant 0 : index
    %3 = vector.load %arg2[%c0_3, %c0_4, %c0_5] : memref<9x4x128xbf16, #tpu.memory_space<vmem>>, vector<1x4x128xbf16>
    %4 = vector.shape_cast %3 : vector<1x4x128xbf16> to vector<4x128xbf16>
    %cst = arith.constant dense<0.000000e+00> : vector<128x128xf32>
    %5 = tpu.matmul %2, %4, %cst {dimension_numbers = #tpu.dot_dimension_numbers<[1], [0], [0], [1], [0, 0, 1, 1], [], []>} : vector<128x4xbf16>, vector<4x128xbf16>, vector<128x128xf32> -> vector<128x128xf32>
    %c0_6 = arith.constant 0 : index
    %c0_7 = arith.constant 0 : index
    %6 = vector.load %arg6[%c0_6, %c0_7] : memref<128x128xf32, #tpu.memory_space<vmem>>, vector<128x128xf32>
    tpu.vector_store %arg6[%c0_6, %c0_7], %5 {strides = array<i32>} : memref<128x128xf32, #tpu.memory_space<vmem>>, vector<128x128xf32>,
    %c0_8 = arith.constant 0 : index
    %c0_9 = arith.constant 0 : index
    %7 = vector.load %arg6[%c0_8, %c0_9] : memref<128x128xf32, #tpu.memory_space<vmem>>, vector<128x128xf32>
    %c0_10 = arith.constant 0 : index
    %c0_11 = arith.constant 0 : index
    %c1 = arith.constant 1 : index
    %c0_12 = arith.constant 0 : index
    %8 = vector.load %arg1[%c0_10, %c0_11, %c1, %c0_12] : memref<8x1x24x4xbf16, #tpu.memory_space<vmem>>, vector<8x1x16x4xbf16>
    %9 = vector.shape_cast %8 : vector<8x1x16x4xbf16> to vector<8x16x4xbf16>
    %10 = vector.shape_cast %9 : vector<8x16x4xbf16> to vector<128x4xbf16>
    %c1_13 = arith.constant 1 : index
    %c0_14 = arith.constant 0 : index
    %c0_15 = arith.constant 0 : index
    %11 = vector.load %arg2[%c1_13, %c0_14, %c0_15] : memref<9x4x128xbf16, #tpu.memory_space<vmem>>, vector<1x4x128xbf16>
    %12 = vector.shape_cast %11 : vector<1x4x128xbf16> to vector<4x128xbf16>
    %cst_16 = arith.constant dense<0.000000e+00> : vector<128x128xf32>
    %13 = tpu.matmul %10, %12, %cst_16 {dimension_numbers = #tpu.dot_dimension_numbers<[1], [0], [0], [1], [0, 0, 1, 1], [], []>} : vector<128x4xbf16>, vector<4x128xbf16>, vector<128x128xf32> -> vector<128x128xf32>
    %14 = arith.addf %7, %13 : vector<128x128xf32>
    %c0_17 = arith.constant 0 : index
    %c0_18 = arith.constant 0 : index
    %15 = vector.load %arg6[%c0_17, %c0_18] : memref<128x128xf32, #tpu.memory_space<vmem>>, vector<128x128xf32>
    tpu.vector_store %arg6[%c0_17, %c0_18], %14 {strides = array<i32>} : memref<128x128xf32, #tpu.memory_space<vmem>>, vector<128x128xf32>,
    %c0_19 = arith.constant 0 : index
    %c0_20 = arith.constant 0 : index
    %16 = vector.load %arg6[%c0_19, %c0_20] : memref<128x128xf32, #tpu.memory_space<vmem>>, vector<128x128xf32>
    %c0_21 = arith.constant 0 : index
    %c0_22 = arith.constant 0 : index
    %c2 = arith.constant 2 : index
    %c0_23 = arith.constant 0 : index
    %17 = vector.load %arg1[%c0_21, %c0_22, %c2, %c0_23] : memref<8x1x24x4xbf16, #tpu.memory_space<vmem>>, vector<8x1x16x4xbf16>
    %18 = vector.shape_cast %17 : vector<8x1x16x4xbf16> to vector<8x16x4xbf16>
    %19 = vector.shape_cast %18 : vector<8x16x4xbf16> to vector<128x4xbf16>
    %c2_24 = arith.constant 2 : index
    %c0_25 = arith.constant 0 : index
    %c0_26 = arith.constant 0 : index
    %20 = vector.load %arg2[%c2_24, %c0_25, %c0_26] : memref<9x4x128xbf16, #tpu.memory_space<vmem>>, vector<1x4x128xbf16>
    %21 = vector.shape_cast %20 : vector<1x4x128xbf16> to vector<4x128xbf16>
    %cst_27 = arith.constant dense<0.000000e+00> : vector<128x128xf32>
    %22 = tpu.matmul %19, %21, %cst_27 {dimension_numbers = #tpu.dot_dimension_numbers<[1], [0], [0], [1], [0, 0, 1, 1], [], []>} : vector<128x4xbf16>, vector<4x128xbf16>, vector<128x128xf32> -> vector<128x128xf32>
    %23 = arith.addf %16, %22 : vector<128x128xf32>
    %c0_28 = arith.constant 0 : index
    %c0_29 = arith.constant 0 : index
    %24 = vector.load %arg6[%c0_28, %c0_29] : memref<128x128xf32, #tpu.memory_space<vmem>>, vector<128x128xf32>
    tpu.vector_store %arg6[%c0_28, %c0_29], %23 {strides = array<i32>} : memref<128x128xf32, #tpu.memory_space<vmem>>, vector<128x128xf32>,
    %c0_30 = arith.constant 0 : index
    %c0_31 = arith.constant 0 : index
    %25 = vector.load %arg6[%c0_30, %c0_31] : memref<128x128xf32, #tpu.memory_space<vmem>>, vector<128x128xf32>
    %c0_32 = arith.constant 0 : index
    %c0_33 = arith.constant 0 : index
    %c3 = arith.constant 3 : index
    %c0_34 = arith.constant 0 : index
    %26 = vector.load %arg1[%c0_32, %c0_33, %c3, %c0_34] : memref<8x1x24x4xbf16, #tpu.memory_space<vmem>>, vector<8x1x16x4xbf16>
    %27 = vector.shape_cast %26 : vector<8x1x16x4xbf16> to vector<8x16x4xbf16>
    %28 = vector.shape_cast %27 : vector<8x16x4xbf16> to vector<128x4xbf16>
    %c3_35 = arith.constant 3 : index
    %c0_36 = arith.constant 0 : index
    %c0_37 = arith.constant 0 : index
    %29 = vector.load %arg2[%c3_35, %c0_36, %c0_37] : memref<9x4x128xbf16, #tpu.memory_space<vmem>>, vector<1x4x128xbf16>
    %30 = vector.shape_cast %29 : vector<1x4x128xbf16> to vector<4x128xbf16>
    %cst_38 = arith.constant dense<0.000000e+00> : vector<128x128xf32>
    %31 = tpu.matmul %28, %30, %cst_38 {dimension_numbers = #tpu.dot_dimension_numbers<[1], [0], [0], [1], [0, 0, 1, 1], [], []>} : vector<128x4xbf16>, vector<4x128xbf16>, vector<128x128xf32> -> vector<128x128xf32>
    %32 = arith.addf %25, %31 : vector<128x128xf32>
    %c0_39 = arith.constant 0 : index
    %c0_40 = arith.constant 0 : index
    %33 = vector.load %arg6[%c0_39, %c0_40] : memref<128x128xf32, #tpu.memory_space<vmem>>, vector<128x128xf32>
    tpu.vector_store %arg6[%c0_39, %c0_40], %32 {strides = array<i32>} : memref<128x128xf32, #tpu.memory_space<vmem>>, vector<128x128xf32>,
    %c0_41 = arith.constant 0 : index
    %c0_42 = arith.constant 0 : index
    %34 = vector.load %arg6[%c0_41, %c0_42] : memref<128x128xf32, #tpu.memory_space<vmem>>, vector<128x128xf32>
    %c0_43 = arith.constant 0 : index
    %c0_44 = arith.constant 0 : index
    %c4 = arith.constant 4 : index
    %c0_45 = arith.constant 0 : index
    %35 = vector.load %arg1[%c0_43, %c0_44, %c4, %c0_45] : memref<8x1x24x4xbf16, #tpu.memory_space<vmem>>, vector<8x1x16x4xbf16>
    %36 = vector.shape_cast %35 : vector<8x1x16x4xbf16> to vector<8x16x4xbf16>
    %37 = vector.shape_cast %36 : vector<8x16x4xbf16> to vector<128x4xbf16>
    %c4_46 = arith.constant 4 : index
    %c0_47 = arith.constant 0 : index
    %c0_48 = arith.constant 0 : index
    %38 = vector.load %arg2[%c4_46, %c0_47, %c0_48] : memref<9x4x128xbf16, #tpu.memory_space<vmem>>, vector<1x4x128xbf16>
    %39 = vector.shape_cast %38 : vector<1x4x128xbf16> to vector<4x128xbf16>
    %cst_49 = arith.constant dense<0.000000e+00> : vector<128x128xf32>
    %40 = tpu.matmul %37, %39, %cst_49 {dimension_numbers = #tpu.dot_dimension_numbers<[1], [0], [0], [1], [0, 0, 1, 1], [], []>} : vector<128x4xbf16>, vector<4x128xbf16>, vector<128x128xf32> -> vector<128x128xf32>
    %41 = arith.addf %34, %40 : vector<128x128xf32>
    %c0_50 = arith.constant 0 : index
    %c0_51 = arith.constant 0 : index
    %42 = vector.load %arg6[%c0_50, %c0_51] : memref<128x128xf32, #tpu.memory_space<vmem>>, vector<128x128xf32>
    tpu.vector_store %arg6[%c0_50, %c0_51], %41 {strides = array<i32>} : memref<128x128xf32, #tpu.memory_space<vmem>>, vector<128x128xf32>,
    %c0_52 = arith.constant 0 : index
    %c0_53 = arith.constant 0 : index
    %43 = vector.load %arg6[%c0_52, %c0_53] : memref<128x128xf32, #tpu.memory_space<vmem>>, vector<128x128xf32>
    %c0_54 = arith.constant 0 : index
    %c0_55 = arith.constant 0 : index
    %c5 = arith.constant 5 : index
    %c0_56 = arith.constant 0 : index
    %44 = vector.load %arg1[%c0_54, %c0_55, %c5, %c0_56] : memref<8x1x24x4xbf16, #tpu.memory_space<vmem>>, vector<8x1x16x4xbf16>
    %45 = vector.shape_cast %44 : vector<8x1x16x4xbf16> to vector<8x16x4xbf16>
    %46 = vector.shape_cast %45 : vector<8x16x4xbf16> to vector<128x4xbf16>
    %c5_57 = arith.constant 5 : index
    %c0_58 = arith.constant 0 : index
    %c0_59 = arith.constant 0 : index
    %47 = vector.load %arg2[%c5_57, %c0_58, %c0_59] : memref<9x4x128xbf16, #tpu.memory_space<vmem>>, vector<1x4x128xbf16>
    %48 = vector.shape_cast %47 : vector<1x4x128xbf16> to vector<4x128xbf16>
    %cst_60 = arith.constant dense<0.000000e+00> : vector<128x128xf32>
    %49 = tpu.matmul %46, %48, %cst_60 {dimension_numbers = #tpu.dot_dimension_numbers<[1], [0], [0], [1], [0, 0, 1, 1], [], []>} : vector<128x4xbf16>, vector<4x128xbf16>, vector<128x128xf32> -> vector<128x128xf32>
    %50 = arith.addf %43, %49 : vector<128x128xf32>
    %c0_61 = arith.constant 0 : index
    %c0_62 = arith.constant 0 : index
    %51 = vector.load %arg6[%c0_61, %c0_62] : memref<128x128xf32, #tpu.memory_space<vmem>>, vector<128x128xf32>
    tpu.vector_store %arg6[%c0_61, %c0_62], %50 {strides = array<i32>} : memref<128x128xf32, #tpu.memory_space<vmem>>, vector<128x128xf32>,
    %c0_63 = arith.constant 0 : index
    %c0_64 = arith.constant 0 : index
    %52 = vector.load %arg6[%c0_63, %c0_64] : memref<128x128xf32, #tpu.memory_space<vmem>>, vector<128x128xf32>
    %c0_65 = arith.constant 0 : index
    %c0_66 = arith.constant 0 : index
    %c6 = arith.constant 6 : index
    %c0_67 = arith.constant 0 : index
    %53 = vector.load %arg1[%c0_65, %c0_66, %c6, %c0_67] : memref<8x1x24x4xbf16, #tpu.memory_space<vmem>>, vector<8x1x16x4xbf16>
    %54 = vector.shape_cast %53 : vector<8x1x16x4xbf16> to vector<8x16x4xbf16>
    %55 = vector.shape_cast %54 : vector<8x16x4xbf16> to vector<128x4xbf16>
    %c6_68 = arith.constant 6 : index
    %c0_69 = arith.constant 0 : index
    %c0_70 = arith.constant 0 : index
    %56 = vector.load %arg2[%c6_68, %c0_69, %c0_70] : memref<9x4x128xbf16, #tpu.memory_space<vmem>>, vector<1x4x128xbf16>
    %57 = vector.shape_cast %56 : vector<1x4x128xbf16> to vector<4x128xbf16>
    %cst_71 = arith.constant dense<0.000000e+00> : vector<128x128xf32>
    %58 = tpu.matmul %55, %57, %cst_71 {dimension_numbers = #tpu.dot_dimension_numbers<[1], [0], [0], [1], [0, 0, 1, 1], [], []>} : vector<128x4xbf16>, vector<4x128xbf16>, vector<128x128xf32> -> vector<128x128xf32>
    %59 = arith.addf %52, %58 : vector<128x128xf32>
    %c0_72 = arith.constant 0 : index
    %c0_73 = arith.constant 0 : index
    %60 = vector.load %arg6[%c0_72, %c0_73] : memref<128x128xf32, #tpu.memory_space<vmem>>, vector<128x128xf32>
    tpu.vector_store %arg6[%c0_72, %c0_73], %59 {strides = array<i32>} : memref<128x128xf32, #tpu.memory_space<vmem>>, vector<128x128xf32>,
    %c0_74 = arith.constant 0 : index
    %c0_75 = arith.constant 0 : index
    %61 = vector.load %arg6[%c0_74, %c0_75] : memref<128x128xf32, #tpu.memory_space<vmem>>, vector<128x128xf32>
    %c0_76 = arith.constant 0 : index
    %c0_77 = arith.constant 0 : index
    %c7 = arith.constant 7 : index
    %c0_78 = arith.constant 0 : index
    %62 = vector.load %arg1[%c0_76, %c0_77, %c7, %c0_78] : memref<8x1x24x4xbf16, #tpu.memory_space<vmem>>, vector<8x1x16x4xbf16>
    %63 = vector.shape_cast %62 : vector<8x1x16x4xbf16> to vector<8x16x4xbf16>
    %64 = vector.shape_cast %63 : vector<8x16x4xbf16> to vector<128x4xbf16>
    %c7_79 = arith.constant 7 : index
    %c0_80 = arith.constant 0 : index
    %c0_81 = arith.constant 0 : index
    %65 = vector.load %arg2[%c7_79, %c0_80, %c0_81] : memref<9x4x128xbf16, #tpu.memory_space<vmem>>, vector<1x4x128xbf16>
    %66 = vector.shape_cast %65 : vector<1x4x128xbf16> to vector<4x128xbf16>
    %cst_82 = arith.constant dense<0.000000e+00> : vector<128x128xf32>
    %67 = tpu.matmul %64, %66, %cst_82 {dimension_numbers = #tpu.dot_dimension_numbers<[1], [0], [0], [1], [0, 0, 1, 1], [], []>} : vector<128x4xbf16>, vector<4x128xbf16>, vector<128x128xf32> -> vector<128x128xf32>
    %68 = arith.addf %61, %67 : vector<128x128xf32>
    %c0_83 = arith.constant 0 : index
    %c0_84 = arith.constant 0 : index
    %69 = vector.load %arg6[%c0_83, %c0_84] : memref<128x128xf32, #tpu.memory_space<vmem>>, vector<128x128xf32>
    tpu.vector_store %arg6[%c0_83, %c0_84], %68 {strides = array<i32>} : memref<128x128xf32, #tpu.memory_space<vmem>>, vector<128x128xf32>,
    %c0_85 = arith.constant 0 : index
    %c0_86 = arith.constant 0 : index
    %70 = vector.load %arg6[%c0_85, %c0_86] : memref<128x128xf32, #tpu.memory_space<vmem>>, vector<128x128xf32>
    %c0_87 = arith.constant 0 : index
    %c0_88 = arith.constant 0 : index
    %c8 = arith.constant 8 : index
    %c0_89 = arith.constant 0 : index
    %71 = vector.load %arg1[%c0_87, %c0_88, %c8, %c0_89] : memref<8x1x24x4xbf16, #tpu.memory_space<vmem>>, vector<8x1x16x4xbf16>
    %72 = vector.shape_cast %71 : vector<8x1x16x4xbf16> to vector<8x16x4xbf16>
    %73 = vector.shape_cast %72 : vector<8x16x4xbf16> to vector<128x4xbf16>
    %c8_90 = arith.constant 8 : index
    %c0_91 = arith.constant 0 : index
    %c0_92 = arith.constant 0 : index
    %74 = vector.load %arg2[%c8_90, %c0_91, %c0_92] : memref<9x4x128xbf16, #tpu.memory_space<vmem>>, vector<1x4x128xbf16>
    %75 = vector.shape_cast %74 : vector<1x4x128xbf16> to vector<4x128xbf16>
    %cst_93 = arith.constant dense<0.000000e+00> : vector<128x128xf32>
    %76 = tpu.matmul %73, %75, %cst_93 {dimension_numbers = #tpu.dot_dimension_numbers<[1], [0], [0], [1], [0, 0, 1, 1], [], []>} : vector<128x4xbf16>, vector<4x128xbf16>, vector<128x128xf32> -> vector<128x128xf32>
    %77 = arith.addf %70, %76 : vector<128x128xf32>
    %c0_94 = arith.constant 0 : index
    %c0_95 = arith.constant 0 : index
    %78 = vector.load %arg6[%c0_94, %c0_95] : memref<128x128xf32, #tpu.memory_space<vmem>>, vector<128x128xf32>
    tpu.vector_store %arg6[%c0_94, %c0_95], %77 {strides = array<i32>} : memref<128x128xf32, #tpu.memory_space<vmem>>, vector<128x128xf32>,
    %c0_96 = arith.constant 0 : index
    %c0_97 = arith.constant 0 : index
    %79 = vector.load %arg6[%c0_96, %c0_97] : memref<128x128xf32, #tpu.memory_space<vmem>>, vector<128x128xf32>
    %c0_98 = arith.constant 0 : index
    %c0_99 = arith.constant 0 : index
    %80 = vector.load %arg3[%c0_98, %c0_99] : memref<1x128xf32, #tpu.memory_space<vmem>>, vector<1x128xf32>
    %81 = vector.broadcast %80 : vector<1x128xf32> to vector<128x128xf32>
    %82 = arith.mulf %79, %81 : vector<128x128xf32>
    %c0_100 = arith.constant 0 : index
    %c0_101 = arith.constant 0 : index
    %83 = vector.load %arg4[%c0_100, %c0_101] : memref<1x128xf32, #tpu.memory_space<vmem>>, vector<1x128xf32>
    %84 = vector.broadcast %83 : vector<1x128xf32> to vector<128x128xf32>
    %85 = arith.addf %82, %84 : vector<128x128xf32>
    %86 = vector.shape_cast %85 : vector<128x128xf32> to vector<8x16x128xf32>
    %c0_102 = arith.constant 0 : index
    %c0_103 = arith.constant 0 : index
    %c0_104 = arith.constant 0 : index
    %87 = vector.load %arg5[%c0_102, %c0_103, %c0_104] : memref<8x16x128xf32, #tpu.memory_space<vmem>>, vector<8x16x128xf32>
    tpu.vector_store %arg5[%c0_102, %c0_103, %c0_104], %86 {strides = array<i32>} : memref<8x16x128xf32, #tpu.memory_space<vmem>>, vector<8x16x128xf32>,
    return
  }
  func.func @transform_0(%arg0: i32) -> (i32, i32, i32, i32) {
    %c0_i32 = arith.constant 0 : i32
    %c0_i32_0 = arith.constant 0 : i32
    %c0_i32_1 = arith.constant 0 : i32
    %c0_i32_2 = arith.constant 0 : i32
    return %arg0, %c0_i32, %c0_i32_0, %c0_i32_1 : i32, i32, i32, i32
  }
  func.func @transform_1(%arg0: i32) -> (i32, i32, i32) {
    %c0_i32 = arith.constant 0 : i32
    %c0_i32_0 = arith.constant 0 : i32
    %c0_i32_1 = arith.constant 0 : i32
    %c0_i32_2 = arith.constant 0 : i32
    return %c0_i32, %c0_i32_0, %c0_i32_1 : i32, i32, i32
  }
  func.func @transform_2(%arg0: i32) -> (i32, i32) {
    %c0_i32 = arith.constant 0 : i32
    %c0_i32_0 = arith.constant 0 : i32
    %c0_i32_1 = arith.constant 0 : i32
    return %c0_i32, %c0_i32_0 : i32, i32
  }
  func.func @transform_3(%arg0: i32) -> (i32, i32) {
    %c0_i32 = arith.constant 0 : i32
    %c0_i32_0 = arith.constant 0 : i32
    %c0_i32_1 = arith.constant 0 : i32
    return %c0_i32, %c0_i32_0 : i32, i32
  }
  func.func @transform_4(%arg0: i32) -> (i32, i32, i32) {
    %c0_i32 = arith.constant 0 : i32
    %c0_i32_0 = arith.constant 0 : i32
    %c0_i32_1 = arith.constant 0 : i32
    return %arg0, %c0_i32, %c0_i32_0 : i32, i32, i32
  }
}

</mosaic_0001>

<bundles_post_ra>
// kernel: unit_tcn_forward.1
= control target key start
LH: loop header
LB: loop body
LE: loop exit
PB: predicated region body
PF: predicated region fallthrough
CT: control target
= control target key end

     0   :  { %s3915_s15 = smov 0   ;;  %s4786_s0 = inlined_call_operand.vmem [shape: bf16[32,1,24,4], index: 0, kind: input, shape index: {}]   ;;  %s4787_s1 = inlined_call_operand.vmem [shape: bf16[9,4,128], index: 1, kind: input, shape index: {}]   ;;  %s4788_s2 = inlined_call_operand.vmem [shape: f32[1,128], index: 2, kind: input, shape index: {}]   ;;  %s4789_s3 = inlined_call_operand.vmem [shape: f32[1,128], index: 3, kind: input, shape index: {}]   ;;  %s4790_s4 = inlined_call_operand.vmem [shape: f32[32,16,128], index: 4, kind: output, shape index: {}]  }
   0x1 LB: > { %s3403_s16 = sadd.s32 4294967295, %s3888_s15   ;;  %p3407_p0 = scmp.ge.s32.totalorder %s3888_s15, 1  ;;  %s3888_s15 = sphi %s3915_s15, %s14_s15  }
   0x2   : > { %p164_p1 = scmp.lt.s32.totalorder %s3888_s15, 5 }
   0x4   : > { %p165_p2 = pnand %p3407_p0, %p164_p1 }
   0x6   : > { %168 = sbr.rel (%p165_p2) target bundleno = 423 (0x1a7), region = 36 }
   0xb   : > { %v223_v0 = vld [vmem:[%s4787_s1] sm:$0x3]  ;;  %vm289_vm0 = vcmask 1041408   ;;  %s3408_s19 = sshll.u32 %s3403_s16, 3  ;;  %v3429_v2 = vld [vmem:[%s4787_s1 + $0x2] sm:$0x3] }
   0xc   : > { %3848 = vmatprep.subr.msk.bf16.mxu1 %vm289_vm0, %v223_v0  ;;  %3847 = vmatprep.subr.msk.bf16.mxu0 %vm289_vm0, %v223_v0  ;;  %v291_v1 = vsel %vm289_vm0, %v223_v0, 0  ;;  %p193_p3 = scmp.lt.s32.totalorder %s3408_s19, 31  ;;  %v3454_v3 = vld [vmem:[%s4787_s1 + $0x4] sm:$0x3]  ;;  %vm264_vm1 = vcmask 31744   ;;  %v692_v7 = vsel %vm289_vm0, %v3429_v2, 0 }
   0xd   : > { %3846 = vmatpush3.bf16.msra.mxu1 %v291_v1  ;;  %3684 = vmatpush3.bf16.msra.mxu0 %v291_v1  ;;  %v3471_v4 = vld [vmem:[%s4787_s1 + $0x6] sm:$0x3]  ;;  %v3496_v5 = vld [vmem:[%s4787_s1 + $0x8] sm:$0x3]  ;;  %vm887_vm2 = vcmask 1042432   ;;  %v997_v10 = vsel %vm289_vm0, %v3454_v3, 0 }
   0xe   : > { %s4846_s19 = smov (!%p193_p3, %s3408_s19), 31  ;;  %3849 = vmatprep.subr.msk.bf16.mxu1 %vm289_vm0, %v3429_v2  ;;  %3850 = vmatprep.subr.msk.bf16.mxu0 %vm289_vm0, %v3454_v3  ;;  %v3956_v8 = vld [vmem:[%s4787_s1 + $0xa] sm:$0x3]  ;;  %v3963_v11 = vld [vmem:[%s4787_s1 + $0xc] sm:$0x3]  ;;  %vm888_vm3 = vcmask 1046532  }
   0xf   : > { %s3857_s24 = smul.u32 12, %s4846_s19  ;;  %v3970_v13 = vld [vmem:[%s4787_s1 + $0xe] sm:$0x3]  ;;  %vm446_vm4 = vsmask.f32 3328  ;;  %v3975_v15 = vsel %vm289_vm0, %v3471_v4, 0  ;;  %vm4010_vm6 = vmor %vm887_vm2, %vm888_vm3 }
  0x10   : > { %vm447_vm5 = vsmask.f32 7440  ;;  %v3980_v17 = vsel %vm289_vm0, %v3496_v5, 0  ;;  %v3986_v19 = vsel %vm289_vm0, %v3956_v8, 0  ;;  %v3992_v21 = vsel %vm289_vm0, %v3963_v11, 0  ;;  %s3601_s17 = sshll.u32 %s4846_s19, 4 }
  0x11   : > { %s3943_s27 = scalar_lea.vmem %s4786_s0, %s3857_s24  ;;  %v3999_v23 = vsel %vm289_vm0, %v3970_v13, 0  ;;  %vm4022_vm7 = vmor %vm446_vm4, %vm447_vm5  ;;  %vm1642_vm8 = vcmask 1045508   ;;  %vm1168_vm9 = vsmask.f32 2304  ;;  %vm1169_vm10 = vsmask.f32 6416  ;;  %s4694_s22 = scalar_lea.vmem %s4790_s4, %s3601_s17 }
  0x12   : > { %v3866_v6 = vld [vmem:[%s3943_s27] sm:$0xff]   ;;  %v3867_v9 = vld [vmem:[%s3943_s27 + $0x30] sm:$0xff]   ;;  %v3870_v16 = vld [vmem:[%s3943_s27 + $0x18] sm:$0xff]   ;;  %vm1922_vm13 = vsmask.f32 1280  ;;  %vm2395_vm15 = vcmask 1040384  }
  0x13   : > { %3685 = vmatprep.mubr.msk.bf16.mxu0 %vm264_vm1, %v3866_v6  ;;  %v3868_v12 = vld [vmem:[%s3943_s27 + $0xc] sm:$0xff]   ;;  %3693 = vmatprep.mubr.msk.bf16.mxu1 %vm264_vm1, %v3867_v9  ;;  %v3869_v14 = vld [vmem:[%s3943_s27 + $0x3c] sm:$0xff]   ;;  %v3872_v20 = vld [vmem:[%s3943_s27 + $0x24] sm:$0xff]   ;;  %vm1923_vm14 = vsmask.f32 5392  ;;  %vm2396_vm2 = vcmask 1044484  }
  0x14   : > { %3686 = vmatmul.mubr.msk.bf16.vlgmr.msra.gmra.mxu0 %vm264_vm1, %v3868_v12  ;;  %3694 = vmatmul.mubr.msk.bf16.vlgmr.msra.gmra.mxu1 %vm264_vm1, %v3869_v14  ;;  %v3871_v18 = vld [vmem:[%s3943_s27 + $0x48] sm:$0xff]   ;;  %v3873_v22 = vld [vmem:[%s3943_s27 + $0x54] sm:$0xff]   ;;  %v422_v24 = vld [vmem:[%s3943_s27] sm:$0xf]  ;;  %vm2677_vm5 = vsmask.f32 4368 }
  0x15   : > { %3720 = vmatpush3.bf16.msra.mxu0 %v997_v10  ;;  %3702 = vmatpush3.bf16.msra.mxu1 %v692_v7  ;;  %v423_v25 = vld [vmem:[%s3943_s27 + $0x4] sm:$0xf]  ;;  %v424_v26 = vld [vmem:[%s3943_s27 + $0x8] sm:$0x1]  ;;  %v450_v27 = vshrl.u32 %v422_v24, 16  ;;  %v453_v28 = vshll.u32 %v422_v24, 16  ;;  %vm4157_vm11 = vmor %vm289_vm0, %vm1642_vm8 }
  0x16   : > { %3689 = vmatprep.mubr.msk.bf16.mxu0 %vm264_vm1, %v3870_v16  ;;  %3697 = vmatprep.mubr.msk.bf16.mxu1 %vm264_vm1, %v3871_v18  ;;  %v459_v29 = vshll.u32 %v423_v25, 16  ;;  %v463_v30 = vshrl.u32 %v423_v25, 16  ;;  %v839_v31 = vld [vmem:[%s3943_s27] sm:$0xe]  ;;  %v469_v32 = vshll.u32 %v424_v26, 16  ;;  %vm4163_vm12 = vmor %vm1168_vm9, %vm1169_vm10 }
  0x17   : > { %3851 = vmatprep.subr.msk.bf16.mxu1 %vm289_vm0, %v3471_v4  ;;  %3852 = vmatprep.subr.msk.bf16.mxu0 %vm289_vm0, %v3496_v5  ;;  %v840_v33 = vld [vmem:[%s3943_s27 + $0x4] sm:$0xf]  ;;  %v841_v34 = vld [vmem:[%s3943_s27 + $0x8] sm:$0x1]  ;;  %v3446_v35 = vrot.slane %v839_v31, 9  ;;  %v452_v36 = vrot.slane %v450_v27, 4  ;;  %vm4307_vm3 = vmor %vm1922_vm13, %vm1923_vm14 }
  0x18   : > { %v455_v37 = vrot.slane %v453_v28, 5  ;;  %v461_v38 = vrot.slane %v459_v29, 5  ;;  %v465_v39 = vrot.slane %v463_v30, 4  ;;  %v425_v41 = vld [vmem:[%s3943_s27 + $0xc] sm:$0xf]  ;;  %v471_v42 = vrot.slane %v469_v32, 5  ;;  %vm4315_vm4 = vmor %vm2395_vm15, %vm2396_vm2 }
  0x19   : > { %v892_v43 = vrot.slane %v840_v33, 5  ;;  %v895_v44 = vrot.slane %v841_v34, 5  ;;  %v426_v45 = vld [vmem:[%s3943_s27 + $0x10] sm:$0xf]  ;;  %v474_v46 = vshrl.u32 %v425_v41, 16  ;;  %v477_v50 = vshll.u32 %v425_v41, 16 }
  0x1a   : > { %v456_v47 = vor.u32 %v455_v37, %v452_v36  ;;  %v466_v48 = vor.u32 %v465_v39, %v461_v38  ;;  %v427_v49 = vld [vmem:[%s3943_s27 + $0x14] sm:$0x1]  ;;  %v483_v51 = vshll.u32 %v426_v45, 16  ;;  %v842_v52 = vld [vmem:[%s3943_s27 + $0xc] sm:$0xe]  ;;  %v487_v57 = vshrl.u32 %v426_v45, 16 }
  0x1b   : > { %v893_v54 = vsel %vm4010_vm6, %v3446_v35, %v892_v43  ;;  %v894_v55 = vrot.slane %v892_v43, 4  ;;  %v476_v56 = vrot.slane %v474_v46, 4  ;;  %v843_v58 = vld [vmem:[%s3943_s27 + $0x10] sm:$0xf]  ;;  %v479_v61 = vrot.slane %v477_v50, 5 }
  0x1c   : > { %3690 = vmatmul.mubr.msk.bf16.gmra.mxu0 %vm264_vm1, %v3872_v20  ;;  %3698 = vmatmul.mubr.msk.bf16.gmra.mxu1 %vm264_vm1, %v3873_v22  ;;  %v457_v59 = vrot.slane %v456_v47, 4  ;;  %v467_v60 = vrot.slane %v466_v48, 4  ;;  %v485_v62 = vrot.slane %v483_v51, 5  ;;  %v844_v63 = vld [vmem:[%s3943_s27 + $0x14] sm:$0x1]  ;;  %v489_v1 = vrot.slane %v487_v57, 4 }
  0x1d   : > { %v896_v0 = vsel %vm4010_vm6, %v894_v55, %v895_v44  ;;  %v493_v2 = vshll.u32 %v427_v49, 16  ;;  %v3447_v3 = vrot.slane %v842_v52, 9  ;;  %v428_v4 = vld [vmem:[%s3943_s27 + $0x18] sm:$0xf]  ;;  %v480_v9 = vor.u32 %v479_v61, %v476_v56  ;;  %v429_v10 = vld [vmem:[%s3943_s27 + $0x1c] sm:$0xf] }
  0x1e   : > { %v462_v5 = vsel %vm4022_vm7, %v457_v59, %v461_v38  ;;  %v472_v6 = vsel %vm4022_vm7, %v467_v60, %v471_v42  ;;  %v3455_v7 = vcombine.low %v893_v54, %v896_v0  ;;  %v490_v14 = vor.u32 %v489_v1, %v485_v62  ;;  %v430_v20 = vld [vmem:[%s3943_s27 + $0x20] sm:$0x1]  ;;  %v845_v27 = vld [vmem:[%s3943_s27 + $0x18] sm:$0xe]  ;;  %v846_v32 = vld [vmem:[%s3943_s27 + $0x1c] sm:$0xf] }
  0x1f   : > { %v3430_v12 = vcombine.low %v462_v5, %v472_v6  ;;  %v495_v16 = vrot.slane %v493_v2, 5  ;;  %v899_v18 = vrot.slane %v843_v58, 5  ;;  %v481_v22 = vrot.slane %v480_v9, 4  ;;  %v847_v37 = vld [vmem:[%s3943_s27 + $0x20] sm:$0x1] }
  0x20   : > { %3721 = vmatprep.mubr.msk.bf16.mxu0 %vm264_vm1, %v3455_v7  ;;  %v902_v24 = vrot.slane %v844_v63, 5  ;;  %v498_v25 = vshrl.u32 %v428_v4, 16  ;;  %v501_v26 = vshll.u32 %v428_v4, 16  ;;  %v491_v28 = vrot.slane %v490_v14, 4  ;;  %v431_v43 = vld [vmem:[%s3943_s27 + $0x24] sm:$0xf] }
  0x21   : > { %3703 = vmatprep.mubr.msk.bf16.mxu1 %vm264_vm1, %v3430_v12  ;;  %v900_v29 = vsel %vm4010_vm6, %v3447_v3, %v899_v18  ;;  %v901_v30 = vrot.slane %v899_v18, 4  ;;  %v507_v31 = vshll.u32 %v429_v10, 16  ;;  %v486_v33 = vsel %vm4022_vm7, %v481_v22, %v485_v62  ;;  %v432_v48 = vld [vmem:[%s3943_s27 + $0x28] sm:$0xf]  ;;  %v433_v54 = vld [vmem:[%s3943_s27 + $0x2c] sm:$0x1] }
  0x22   : > { %v500_v34 = vrot.slane %v498_v25, 4  ;;  %v503_v35 = vrot.slane %v501_v26, 5  ;;  %v511_v36 = vshrl.u32 %v429_v10, 16  ;;  %v496_v38 = vsel %vm4022_vm7, %v491_v28, %v495_v16  ;;  %v848_v59 = vld [vmem:[%s3943_s27 + $0x24] sm:$0xe] }
  0x23   : > { %v903_v39 = vsel %vm4010_vm6, %v901_v30, %v902_v24  ;;  %v509_v41 = vrot.slane %v507_v31, 5  ;;  %v517_v42 = vshll.u32 %v430_v20, 16  ;;  %v3431_v44 = vcombine.low %v486_v33, %v496_v38  ;;  %v849_v0 = vld [vmem:[%s3943_s27 + $0x28] sm:$0xf]  ;;  %v850_v5 = vld [vmem:[%s3943_s27 + $0x2c] sm:$0x1] }
  0x24   : > { %v3456_v45 = vcombine.low %v900_v29, %v903_v39  ;;  %v504_v46 = vor.u32 %v503_v35, %v500_v34  ;;  %v513_v47 = vrot.slane %v511_v36, 4  ;;  %v3448_v50 = vrot.slane %v845_v27, 9  ;;  %v434_v9 = vld [vmem:[%s3943_s27 + $0x30] sm:$0xf]  ;;  %v435_v18 = vld [vmem:[%s3943_s27 + $0x34] sm:$0xf] }
  0x25   : > { %v519_v49 = vrot.slane %v517_v42, 5  ;;  %v906_v51 = vrot.slane %v846_v32, 5  ;;  %v909_v52 = vrot.slane %v847_v37, 5  ;;  %3704 = vmatmul.mubr.msk.bf16.vlgmr.msra.gmra.mxu1 %vm264_vm1, %v3431_v44  ;;  %v522_v57 = vshrl.u32 %v431_v43, 16  ;;  %v436_v24 = vld [vmem:[%s3943_s27 + $0x38] sm:$0x1] }
  0x26   : > { %3722 = vmatmul.mubr.msk.bf16.vlgmr.msra.gmra.mxu0 %vm264_vm1, %v3456_v45  ;;  %v505_v55 = vrot.slane %v504_v46, 4  ;;  %v514_v56 = vor.u32 %v513_v47, %v509_v41  ;;  %v525_v58 = vshll.u32 %v431_v43, 16  ;;  %3738 = vmatpush3.bf16.msra.mxu1 %v3975_v15  ;;  %v531_v62 = vshll.u32 %v432_v48, 16  ;;  %v851_v29 = vld [vmem:[%s3943_s27 + $0x30] sm:$0xe] }
  0x27   : > { %3756 = vmatpush3.bf16.msra.mxu0 %v3980_v17  ;;  %v907_v60 = vsel %vm4010_vm6, %v3448_v50, %v906_v51  ;;  %v908_v61 = vrot.slane %v906_v51, 4  ;;  %v535_v63 = vshrl.u32 %v432_v48, 16  ;;  %v524_v3 = vrot.slane %v522_v57, 4  ;;  %3853 = vmatprep.subr.msk.bf16.mxu1 %vm289_vm0, %v3956_v8  ;;  %v852_v34 = vld [vmem:[%s3943_s27 + $0x34] sm:$0xf] }
  0x28   : > { %v510_v1 = vsel %vm4022_vm7, %v505_v55, %v509_v41  ;;  %v515_v2 = vrot.slane %v514_v56, 4  ;;  %v527_v4 = vrot.slane %v525_v58, 5  ;;  %3854 = vmatprep.subr.msk.bf16.mxu0 %vm289_vm0, %v3963_v11  ;;  %v533_v17 = vrot.slane %v531_v62, 5  ;;  %v853_v39 = vld [vmem:[%s3943_s27 + $0x38] sm:$0x1] }
  0x29   : > { %v910_v15 = vsel %vm4010_vm6, %v908_v61, %v909_v52  ;;  %v537_v6 = vrot.slane %v535_v63, 4  ;;  %v541_v7 = vshll.u32 %v433_v54, 16  ;;  %v3449_v16 = vrot.slane %v848_v59, 9  ;;  %v437_v45 = vld [vmem:[%s3943_s27 + $0x3c] sm:$0xf] }
  0x2a   : > { %v520_v10 = vsel %vm4022_vm7, %v515_v2, %v519_v49  ;;  %v3457_v12 = vcombine.low %v907_v60, %v910_v15  ;;  %v528_v14 = vor.u32 %v527_v4, %v524_v3  ;;  %v913_v11 = vrot.slane %v849_v0, 5  ;;  %v438_v50 = vld [vmem:[%s3943_s27 + $0x40] sm:$0xf]  ;;  %v439_v56 = vld [vmem:[%s3943_s27 + $0x44] sm:$0x1] }
  0x2b   : > { %v3432_v8 = vcombine.low %v510_v1, %v520_v10  ;;  %v538_v20 = vor.u32 %v537_v6, %v533_v17  ;;  %v543_v22 = vrot.slane %v541_v7, 5  ;;  %v916_v26 = vrot.slane %v850_v5, 5  ;;  %v854_v61 = vld [vmem:[%s3943_s27 + $0x3c] sm:$0xe]  ;;  %v855_v2 = vld [vmem:[%s3943_s27 + $0x40] sm:$0xf] }
  0x2c   : > { %3725 = vmatprep.mubr.msk.bf16.mxu0 %vm264_vm1, %v3457_v12  ;;  %v529_v25 = vrot.slane %v528_v14, 4  ;;  %v546_v27 = vshrl.u32 %v434_v9, 16  ;;  %v549_v28 = vshll.u32 %v434_v9, 16  ;;  %v914_v31 = vsel %vm4010_vm6, %v3449_v16, %v913_v11  ;;  %v440_v12 = vld [vmem:[%s3943_s27 + $0x48] sm:$0xf] }
  0x2d   : > { %3707 = vmatprep.mubr.msk.bf16.mxu1 %vm264_vm1, %v3432_v8  ;;  %v539_v30 = vrot.slane %v538_v20, 4  ;;  %v915_v32 = vrot.slane %v913_v11, 4  ;;  %v555_v33 = vshll.u32 %v435_v18, 16  ;;  %v559_v38 = vshrl.u32 %v435_v18, 16  ;;  %v441_v20 = vld [vmem:[%s3943_s27 + $0x4c] sm:$0xf] }
  0x2e   : > { %v534_v35 = vsel %vm4022_vm7, %v529_v25, %v533_v17  ;;  %v548_v36 = vrot.slane %v546_v27, 4  ;;  %v551_v37 = vrot.slane %v549_v28, 5  ;;  %v565_v44 = vshll.u32 %v436_v24, 16  ;;  %v856_v17 = vld [vmem:[%s3943_s27 + $0x44] sm:$0x1] }
  0x2f   : > { %v544_v41 = vsel %vm4022_vm7, %v539_v30, %v543_v22  ;;  %v917_v42 = vsel %vm4010_vm6, %v915_v32, %v916_v26  ;;  %v557_v43 = vrot.slane %v555_v33, 5  ;;  %v561_v49 = vrot.slane %v559_v38, 4  ;;  %v442_v26 = vld [vmem:[%s3943_s27 + $0x50] sm:$0x1] }
  0x30   : > { %v3433_v46 = vcombine.low %v534_v35, %v544_v41  ;;  %v3458_v47 = vcombine.low %v914_v31, %v917_v42  ;;  %v552_v48 = vor.u32 %v551_v37, %v548_v36  ;;  %v567_v51 = vrot.slane %v565_v44, 5  ;;  %v857_v31 = vld [vmem:[%s3943_s27 + $0x48] sm:$0xe]  ;;  %v858_v36 = vld [vmem:[%s3943_s27 + $0x4c] sm:$0xf] }
  0x31   : > { %v3450_v52 = vrot.slane %v851_v29, 9  ;;  %v920_v54 = vrot.slane %v852_v34, 5  ;;  %v923_v55 = vrot.slane %v853_v39, 5  ;;  %v562_v58 = vor.u32 %v561_v49, %v557_v43  ;;  %v859_v42 = vld [vmem:[%s3943_s27 + $0x50] sm:$0x1] }
  0x32   : > { %3708 = vmatmul.mubr.msk.bf16.gmra.mxu1 %vm264_vm1, %v3433_v46  ;;  %3726 = vmatmul.mubr.msk.bf16.gmra.mxu0 %vm264_vm1, %v3458_v47  ;;  %v553_v57 = vrot.slane %v552_v48, 4  ;;  %v570_v59 = vshrl.u32 %v437_v45, 16  ;;  %v573_v60 = vshll.u32 %v437_v45, 16  ;;  %v579_v0 = vshll.u32 %v438_v50, 16  ;;  %v443_v47 = vld [vmem:[%s3943_s27 + $0x54] sm:$0xf] }
  0x33   : > { %v921_v62 = vsel %vm4010_vm6, %v3450_v52, %v920_v54  ;;  %v922_v63 = vrot.slane %v920_v54, 4  ;;  %v583_v1 = vshrl.u32 %v438_v50, 16  ;;  %v563_v4 = vrot.slane %v562_v58, 4  ;;  %v444_v52 = vld [vmem:[%s3943_s27 + $0x58] sm:$0xf] }
  0x34   : > { %v558_v3 = vsel %vm4022_vm7, %v553_v57, %v557_v43  ;;  %v572_v5 = vrot.slane %v570_v59, 4  ;;  %v575_v15 = vrot.slane %v573_v60, 5  ;;  %v581_v7 = vrot.slane %v579_v0, 5  ;;  %v445_v58 = vld [vmem:[%s3943_s27 + $0x5c] sm:$0x1] }
  0x35   : > { %v924_v6 = vsel %vm4010_vm6, %v922_v63, %v923_v55  ;;  %v585_v9 = vrot.slane %v583_v1, 4  ;;  %v589_v10 = vshll.u32 %v439_v56, 16  ;;  %v568_v14 = vsel %vm4022_vm7, %v563_v4, %v567_v51  ;;  %v860_v63 = vld [vmem:[%s3943_s27 + $0x54] sm:$0xe]  ;;  %v861_v4 = vld [vmem:[%s3943_s27 + $0x58] sm:$0xf] }
  0x36   : > { %v3459_v16 = vcombine.low %v921_v62, %v924_v6  ;;  %v576_v18 = vor.u32 %v575_v15, %v572_v5  ;;  %v3451_v8 = vrot.slane %v854_v61, 9  ;;  %v3434_v22 = vcombine.low %v558_v3, %v568_v14 }
  0x37   : > { %v586_v11 = vor.u32 %v585_v9, %v581_v7  ;;  %v591_v24 = vrot.slane %v589_v10, 5  ;;  %v927_v25 = vrot.slane %v855_v2, 5  ;;  %v930_v28 = vrot.slane %v856_v17, 5 }
  0x38   : > { %3729 = vmatprep.mubr.msk.bf16.mxu0 %vm264_vm1, %v3459_v16  ;;  %v577_v27 = vrot.slane %v576_v18, 4  ;;  %v594_v29 = vshrl.u32 %v440_v12, 16  ;;  %v597_v30 = vshll.u32 %v440_v12, 16  ;;  %3711 = vmatprep.mubr.msk.bf16.mxu1 %vm264_vm1, %v3434_v22  ;;  %v603_v35 = vshll.u32 %v441_v20, 16  ;;  %v1144_v16 = vld [vmem:[%s3943_s27] sm:$0xe] }
  0x39   : > { %v587_v32 = vrot.slane %v586_v11, 4  ;;  %v928_v33 = vsel %vm4010_vm6, %v3451_v8, %v927_v25  ;;  %v929_v34 = vrot.slane %v927_v25, 4  ;;  %v607_v41 = vshrl.u32 %v441_v20, 16  ;;  %v1145_v11 = vld [vmem:[%s3943_s27 + $0x4] sm:$0xf] }
  0x3a   : > { %v582_v37 = vsel %vm4022_vm7, %v577_v27, %v581_v7  ;;  %v596_v38 = vrot.slane %v594_v29, 4  ;;  %v599_v39 = vrot.slane %v597_v30, 5  ;;  %v605_v45 = vrot.slane %v603_v35, 5  ;;  %v862_v7 = vld [vmem:[%s3943_s27 + $0x5c] sm:$0x1] }
  0x3b   : > { %v592_v43 = vsel %vm4022_vm7, %v587_v32, %v591_v24  ;;  %v931_v44 = vsel %vm4010_vm6, %v929_v34, %v930_v28  ;;  %v613_v46 = vshll.u32 %v442_v26, 16  ;;  %v609_v51 = vrot.slane %v607_v41, 4  ;;  %v1146_v30 = vld [vmem:[%s3943_s27 + $0x8] sm:$0x3] }
  0x3c   : > { %v3435_v48 = vcombine.low %v582_v37, %v592_v43  ;;  %v3460_v49 = vcombine.low %v928_v33, %v931_v44  ;;  %v600_v50 = vor.u32 %v599_v39, %v596_v38  ;;  %v3452_v55 = vrot.slane %v857_v31, 9  ;;  %v1593_v37 = vld [vmem:[%s3943_s27] sm:$0xc]  ;;  %v1594_v43 = vld [vmem:[%s3943_s27 + $0x4] sm:$0xf] }
  0x3d   : > { %v615_v54 = vrot.slane %v613_v46, 5  ;;  %v934_v56 = vrot.slane %v858_v36, 5  ;;  %v937_v57 = vrot.slane %v859_v42, 5  ;;  %v610_v60 = vor.u32 %v609_v51, %v605_v45 }
  0x3e   : > { %3712 = vmatmul.mubr.msk.bf16.gmra.mxu1 %vm264_vm1, %v3435_v48  ;;  %3730 = vmatmul.mubr.msk.bf16.gmra.mxu0 %vm264_vm1, %v3460_v49  ;;  %v601_v59 = vrot.slane %v600_v50, 4  ;;  %v618_v61 = vshrl.u32 %v443_v47, 16  ;;  %v621_v62 = vshll.u32 %v443_v47, 16  ;;  %v627_v2 = vshll.u32 %v444_v52, 16  ;;  %v1595_v48 = vld [vmem:[%s3943_s27 + $0x8] sm:$0x3] }
  0x3f   : > { %v935_v0 = vsel %vm4010_vm6, %v3452_v55, %v934_v56  ;;  %v936_v1 = vrot.slane %v934_v56, 4  ;;  %v631_v3 = vshrl.u32 %v444_v52, 16  ;;  %v611_v15 = vrot.slane %v610_v60, 4  ;;  %v1147_v49 = vld [vmem:[%s3943_s27 + $0xc] sm:$0xe] }
  0x40   : > { %v606_v5 = vsel %vm4022_vm7, %v601_v59, %v605_v45  ;;  %v620_v17 = vrot.slane %v618_v61, 4  ;;  %v623_v6 = vrot.slane %v621_v62, 5  ;;  %v629_v10 = vrot.slane %v627_v2, 5  ;;  %v1148_v59 = vld [vmem:[%s3943_s27 + $0x10] sm:$0xf] }
  0x41   : > { %v938_v9 = vsel %vm4010_vm6, %v936_v1, %v937_v57  ;;  %v633_v12 = vrot.slane %v631_v3, 4  ;;  %v637_v14 = vshll.u32 %v445_v58, 16  ;;  %v616_v18 = vsel %vm4022_vm7, %v611_v15, %v615_v54  ;;  %v1149_v3 = vld [vmem:[%s3943_s27 + $0x14] sm:$0x3]  ;;  %v1902_v55 = vld [vmem:[%s3943_s27 + $0x10] sm:$0xf] }
  0x42   : > { %v3461_v8 = vcombine.low %v935_v0, %v938_v9  ;;  %v624_v20 = vor.u32 %v623_v6, %v620_v17  ;;  %v3453_v22 = vrot.slane %v860_v63, 9  ;;  %v3436_v24 = vcombine.low %v606_v5, %v616_v18  ;;  %v1598_v18 = vld [vmem:[%s3943_s27 + $0x14] sm:$0x3] }
  0x43   : > { %v634_v25 = vor.u32 %v633_v12, %v629_v10  ;;  %v639_v26 = vrot.slane %v637_v14, 5  ;;  %v941_v27 = vrot.slane %v861_v4, 5  ;;  %v944_v29 = vrot.slane %v862_v7, 5  ;;  %v1596_v7 = vld [vmem:[%s3943_s27 + $0xc] sm:$0xc] }
  0x44   : > { %3733 = vmatprep.mubr.msk.bf16.mxu0 %vm264_vm1, %v3461_v8  ;;  %v625_v28 = vrot.slane %v624_v20, 4  ;;  %v1172_v31 = vshrl.u32 %v1144_v16, 16  ;;  %v1175_v32 = vshll.u32 %v1144_v16, 16  ;;  %3715 = vmatprep.mubr.msk.bf16.mxu1 %vm264_vm1, %v3436_v24  ;;  %v1181_v36 = vshrl.u32 %v1145_v11, 16  ;;  %v1597_v16 = vld [vmem:[%s3943_s27 + $0x10] sm:$0xf] }
  0x45   : > { %v635_v33 = vrot.slane %v634_v25, 4  ;;  %v942_v34 = vsel %vm4010_vm6, %v3453_v22, %v941_v27  ;;  %v943_v35 = vrot.slane %v941_v27, 4  ;;  %v1184_v42 = vshll.u32 %v1145_v11, 16  ;;  %v1150_v24 = vld [vmem:[%s3943_s27 + $0x18] sm:$0xe] }
  0x46   : > { %v630_v38 = vsel %vm4022_vm7, %v625_v28, %v629_v10  ;;  %v1174_v39 = vrot.slane %v1172_v31, 5  ;;  %v1177_v41 = vrot.slane %v1175_v32, 6  ;;  %v1183_v46 = vrot.slane %v1181_v36, 5 }
  0x47   : > { %v640_v44 = vsel %vm4022_vm7, %v635_v33, %v639_v26  ;;  %v945_v45 = vsel %vm4010_vm6, %v943_v35, %v944_v29  ;;  %v1191_v47 = vshrl.u32 %v1146_v30, 16  ;;  %v1186_v54 = vrot.slane %v1184_v42, 6  ;;  %v1151_v33 = vld [vmem:[%s3943_s27 + $0x1c] sm:$0xf] }
  0x48   : > { %v3437_v50 = vcombine.low %v630_v38, %v640_v44  ;;  %v3462_v51 = vcombine.low %v942_v34, %v945_v45  ;;  %v1178_v52 = vor.u32 %v1177_v41, %v1174_v39  ;;  %v1194_v56 = vshll.u32 %v1146_v30, 16  ;;  %v1599_v44 = vld [vmem:[%s3943_s27 + $0x18] sm:$0xc] }
  0x49   : > { %v1193_v53 = vrot.slane %v1191_v47, 5  ;;  %v3488_v57 = vrot.slane %v1593_v37, 10  ;;  %v1646_v58 = vrot.slane %v1594_v43, 6  ;;  %v1187_v61 = vor.u32 %v1186_v54, %v1183_v46  ;;  %v1152_v37 = vld [vmem:[%s3943_s27 + $0x20] sm:$0x3] }
  0x4a   : > { %3716 = vmatmul.mubr.msk.bf16.gmra.mxu1 %vm264_vm1, %v3437_v50  ;;  %3734 = vmatmul.mubr.msk.bf16.gmra.mxu0 %vm264_vm1, %v3462_v51  ;;  %v1179_v60 = vrot.slane %v1178_v52, 4  ;;  %v1649_v62 = vrot.slane %v1595_v48, 6  ;;  %v1200_v63 = vshrl.u32 %v1147_v49, 16  ;;  %v1196_v0 = vrot.slane %v1194_v56, 6 }
  0x4b   : > { %v1647_v1 = vsel %vm4157_vm11, %v3488_v57, %v1646_v58  ;;  %v1648_v2 = vrot.slane %v1646_v58, 4  ;;  %v1203_v4 = vshll.u32 %v1147_v49, 16  ;;  %v1189_v15 = vrot.slane %v1187_v61, 4  ;;  %v1600_v49 = vld [vmem:[%s3943_s27 + $0x1c] sm:$0xf] }
  0x4c   : > { %v1188_v5 = vsel %vm4163_vm12, %v1179_v60, %v1187_v61  ;;  %v1202_v17 = vrot.slane %v1200_v63, 5  ;;  %v1209_v6 = vshrl.u32 %v1148_v59, 16  ;;  %v1197_v9 = vor.u32 %v1196_v0, %v1193_v53  ;;  %v1601_v53 = vld [vmem:[%s3943_s27 + $0x20] sm:$0x3]  ;;  %v1153_v60 = vld [vmem:[%s3943_s27 + $0x24] sm:$0xe] }
  0x4d   : > { %v1650_v10 = vsel %vm4157_vm11, %v1648_v2, %v1649_v62  ;;  %v1205_v12 = vrot.slane %v1203_v4, 6  ;;  %v1212_v14 = vshll.u32 %v1148_v59, 16  ;;  %v1219_v22 = vshrl.u32 %v1149_v3, 16 }
  0x4e   : > { %v3497_v8 = vcombine.low %v1647_v1, %v1650_v10  ;;  %v1211_v20 = vrot.slane %v1209_v6, 5  ;;  %v1222_v11 = vshll.u32 %v1149_v3, 16  ;;  %v1198_v25 = vsel %vm4163_vm12, %v1189_v15, %v1197_v9  ;;  %v1154_v1 = vld [vmem:[%s3943_s27 + $0x28] sm:$0xf]  ;;  %v1155_v6 = vld [vmem:[%s3943_s27 + $0x2c] sm:$0x3] }
  0x4f   : > { %v1206_v26 = vor.u32 %v1205_v12, %v1202_v17  ;;  %v1214_v27 = vrot.slane %v1212_v14, 6  ;;  %v3489_v28 = vrot.slane %v1596_v7, 10  ;;  %v3472_v29 = vcombine.low %v1188_v5, %v1198_v25 }
  0x50   : > { %3757 = vmatprep.mubr.msk.bf16.mxu0 %vm264_vm1, %v3497_v8  ;;  %v1221_v30 = vrot.slane %v1219_v22, 5  ;;  %v1224_v31 = vrot.slane %v1222_v11, 6  ;;  %v1653_v32 = vrot.slane %v1597_v16, 6  ;;  %v1656_v36 = vrot.slane %v1598_v18, 6  ;;  %v1602_v18 = vld [vmem:[%s3943_s27 + $0x24] sm:$0xc] }
  0x51   : > { %v1207_v34 = vrot.slane %v1206_v26, 4  ;;  %v1215_v35 = vor.u32 %v1214_v27, %v1211_v20  ;;  %v1228_v38 = vshrl.u32 %v1150_v24, 16  ;;  %3739 = vmatprep.mubr.msk.bf16.mxu1 %vm264_vm1, %v3472_v29  ;;  %v1231_v43 = vshll.u32 %v1150_v24, 16  ;;  %v1603_v11 = vld [vmem:[%s3943_s27 + $0x28] sm:$0xf] }
  0x52   : > { %v1225_v39 = vor.u32 %v1224_v31, %v1221_v30  ;;  %v1654_v41 = vsel %vm4157_vm11, %v3489_v28, %v1653_v32  ;;  %v1655_v42 = vrot.slane %v1653_v32, 4  ;;  %v1237_v48 = vshrl.u32 %v1151_v33, 16  ;;  %v1604_v27 = vld [vmem:[%s3943_s27 + $0x2c] sm:$0x3]  ;;  %v1156_v32 = vld [vmem:[%s3943_s27 + $0x30] sm:$0xe] }
  0x53   : > { %v1216_v45 = vsel %vm4163_vm12, %v1207_v34, %v1215_v35  ;;  %v1217_v46 = vrot.slane %v1215_v35, 4  ;;  %v1230_v47 = vrot.slane %v1228_v38, 5  ;;  %v1233_v51 = vrot.slane %v1231_v43, 6  ;;  %v1158_v43 = vld [vmem:[%s3943_s27 + $0x38] sm:$0x3] }
  0x54   : > { %v1657_v50 = vsel %vm4157_vm11, %v1655_v42, %v1656_v36  ;;  %v1240_v52 = vshll.u32 %v1151_v33, 16  ;;  %v1247_v54 = vshrl.u32 %v1152_v37, 16  ;;  %v1239_v58 = vrot.slane %v1237_v48, 5  ;;  %v1157_v33 = vld [vmem:[%s3943_s27 + $0x34] sm:$0xf] }
  0x55   : > { %v1226_v56 = vsel %vm4163_vm12, %v1217_v46, %v1225_v39  ;;  %v3498_v57 = vcombine.low %v1654_v41, %v1657_v50  ;;  %v1250_v59 = vshll.u32 %v1152_v37, 16  ;;  %v1234_v62 = vor.u32 %v1233_v51, %v1230_v47  ;;  %v1605_v51 = vld [vmem:[%s3943_s27 + $0x30] sm:$0xc] }
  0x56   : > { %v3473_v61 = vcombine.low %v1216_v45, %v1226_v56  ;;  %v1242_v63 = vrot.slane %v1240_v52, 6  ;;  %v1249_v0 = vrot.slane %v1247_v54, 5  ;;  %v3490_v3 = vrot.slane %v1599_v44, 10  ;;  %v1606_v52 = vld [vmem:[%s3943_s27 + $0x34] sm:$0xf] }
  0x57   : > { %3758 = vmatmul.mubr.msk.bf16.vlgmr.msra.gmra.mxu0 %vm264_vm1, %v3498_v57  ;;  %v1252_v2 = vrot.slane %v1250_v59, 6  ;;  %v1660_v4 = vrot.slane %v1600_v49, 6  ;;  %v1663_v5 = vrot.slane %v1601_v53, 6  ;;  %v1235_v15 = vrot.slane %v1234_v62, 4 }
  0x58   : > { %3740 = vmatmul.mubr.msk.bf16.vlgmr.msra.gmra.mxu1 %vm264_vm1, %v3473_v61  ;;  %3792 = vmatpush3.bf16.msra.mxu0 %v3992_v21  ;;  %v1243_v17 = vor.u32 %v1242_v63, %v1239_v58  ;;  %v1256_v7 = vshrl.u32 %v1153_v60, 16  ;;  %v1259_v9 = vshll.u32 %v1153_v60, 16  ;;  %v1265_v16 = vshrl.u32 %v1154_v1, 16  ;;  %v1607_v58 = vld [vmem:[%s3943_s27 + $0x38] sm:$0x3] }
  0x59   : > { %3774 = vmatpush3.bf16.msra.mxu1 %v3986_v19  ;;  %v1253_v10 = vor.u32 %v1252_v2, %v1249_v0  ;;  %v1661_v12 = vsel %vm4157_vm11, %v3490_v3, %v1660_v4  ;;  %v1662_v14 = vrot.slane %v1660_v4, 4  ;;  %v1268_v25 = vshll.u32 %v1154_v1, 16  ;;  %v1159_v63 = vld [vmem:[%s3943_s27 + $0x3c] sm:$0xe]  ;;  %v1160_v4 = vld [vmem:[%s3943_s27 + $0x40] sm:$0xf] }
  0x5a   : > { %v1244_v21 = vsel %vm4163_vm12, %v1235_v15, %v1243_v17  ;;  %v1245_v8 = vrot.slane %v1243_v17, 4  ;;  %v1258_v20 = vrot.slane %v1256_v7, 5  ;;  %v1261_v22 = vrot.slane %v1259_v9, 6  ;;  %3855 = vmatprep.subr.msk.bf16.mxu1 %vm289_vm0, %v3970_v13 }
  0x5b   : > { %v1664_v19 = vsel %vm4157_vm11, %v1662_v14, %v1663_v5  ;;  %v1267_v24 = vrot.slane %v1265_v16, 5  ;;  %v1275_v26 = vshrl.u32 %v1155_v6, 16  ;;  %v1278_v31 = vshll.u32 %v1155_v6, 16  ;;  %v4239_v5 = vld [vmem:[%s4787_s1 + $0x10] sm:$0x3] }
  0x5c   : > { %v1254_v28 = vsel %vm4163_vm12, %v1245_v8, %v1253_v10  ;;  %v3499_v29 = vcombine.low %v1661_v12, %v1664_v19  ;;  %v1262_v30 = vor.u32 %v1261_v22, %v1258_v20  ;;  %v1270_v35 = vrot.slane %v1268_v25, 6  ;;  %3856 = vmatprep.subr.msk.bf16.mxu0 %vm289_vm0, %v4239_v5  ;;  %v1608_v25 = vld [vmem:[%s3943_s27 + $0x3c] sm:$0xc] }
  0x5d   : > { %v3474_v34 = vcombine.low %v1244_v21, %v1254_v28  ;;  %v1277_v36 = vrot.slane %v1275_v26, 5  ;;  %v3491_v13 = vrot.slane %v1602_v18, 10  ;;  %v1280_v38 = vrot.slane %v1278_v31, 6  ;;  %v1161_v18 = vld [vmem:[%s3943_s27 + $0x44] sm:$0x3] }
  0x5e   : > { %3761 = vmatprep.mubr.msk.bf16.mxu0 %vm264_vm1, %v3499_v29  ;;  %v1263_v37 = vrot.slane %v1262_v30, 4  ;;  %v1667_v39 = vrot.slane %v1603_v11, 6  ;;  %v1670_v41 = vrot.slane %v1604_v27, 6  ;;  %v1271_v42 = vor.u32 %v1270_v35, %v1267_v24  ;;  %v1609_v30 = vld [vmem:[%s3943_s27 + $0x40] sm:$0xf] }
  0x5f   : > { %3743 = vmatprep.mubr.msk.bf16.mxu1 %vm264_vm1, %v3474_v34  ;;  %v1284_v44 = vshrl.u32 %v1156_v32, 16  ;;  %v1287_v45 = vshll.u32 %v1156_v32, 16  ;;  %v1293_v46 = vshrl.u32 %v1157_v33, 16  ;;  %v1281_v47 = vor.u32 %v1280_v38, %v1277_v36  ;;  %v1610_v35 = vld [vmem:[%s3943_s27 + $0x44] sm:$0x3] }
  0x60   : > { %v1668_v48 = vsel %vm4157_vm11, %v3491_v13, %v1667_v39  ;;  %v1669_v49 = vrot.slane %v1667_v39, 4  ;;  %v1296_v50 = vshll.u32 %v1157_v33, 16  ;;  %v1272_v54 = vsel %vm4163_vm12, %v1263_v37, %v1271_v42  ;;  %v1162_v36 = vld [vmem:[%s3943_s27 + $0x48] sm:$0xe] }
  0x61   : > { %v1273_v53 = vrot.slane %v1271_v42, 4  ;;  %v1286_v56 = vrot.slane %v1284_v44, 5  ;;  %v1289_v57 = vrot.slane %v1287_v45, 6  ;;  %v1295_v60 = vrot.slane %v1293_v46, 5  ;;  %v1163_v45 = vld [vmem:[%s3943_s27 + $0x4c] sm:$0xf] }
  0x62   : > { %v1671_v59 = vsel %vm4157_vm11, %v1669_v49, %v1670_v41  ;;  %v1298_v61 = vrot.slane %v1296_v50, 6  ;;  %v1303_v62 = vshrl.u32 %v1158_v43, 16  ;;  %v1306_v3 = vshll.u32 %v1158_v43, 16  ;;  %v1164_v49 = vld [vmem:[%s3943_s27 + $0x50] sm:$0x3] }
  0x63   : > { %v1282_v0 = vsel %vm4163_vm12, %v1273_v53, %v1281_v47  ;;  %v3500_v1 = vcombine.low %v1668_v48, %v1671_v59  ;;  %v1290_v2 = vor.u32 %v1289_v57, %v1286_v56  ;;  %v3492_v7 = vrot.slane %v1605_v51, 10  ;;  %v1611_v56 = vld [vmem:[%s3943_s27 + $0x48] sm:$0xc] }
  0x64   : > { %v3475_v15 = vcombine.low %v1272_v54, %v1282_v0  ;;  %v1299_v17 = vor.u32 %v1298_v61, %v1295_v60  ;;  %v1305_v6 = vrot.slane %v1303_v62, 5  ;;  %v1308_v10 = vrot.slane %v1306_v3, 6  ;;  %v1612_v61 = vld [vmem:[%s3943_s27 + $0x4c] sm:$0xf] }
  0x65   : > { %3762 = vmatmul.mubr.msk.bf16.gmra.mxu0 %vm264_vm1, %v3500_v1  ;;  %v1291_v9 = vrot.slane %v1290_v2, 4  ;;  %v1674_v12 = vrot.slane %v1606_v52, 6  ;;  %v1677_v14 = vrot.slane %v1607_v58, 6  ;;  %v1312_v21 = vshrl.u32 %v1159_v63, 16  ;;  %v1613_v2 = vld [vmem:[%s3943_s27 + $0x50] sm:$0x3] }
  0x66   : > { %3744 = vmatmul.mubr.msk.bf16.gmra.mxu1 %vm264_vm1, %v3475_v15  ;;  %v1301_v16 = vrot.slane %v1299_v17, 4  ;;  %v1315_v8 = vshll.u32 %v1159_v63, 16  ;;  %v1321_v20 = vshrl.u32 %v1160_v4, 16  ;;  %v1309_v11 = vor.u32 %v1308_v10, %v1305_v6  ;;  %v1165_v6 = vld [vmem:[%s3943_s27 + $0x54] sm:$0xe] }
  0x67   : > { %v1300_v22 = vsel %vm4163_vm12, %v1291_v9, %v1299_v17  ;;  %v1675_v19 = vsel %vm4157_vm11, %v3492_v7, %v1674_v12  ;;  %v1676_v24 = vrot.slane %v1674_v12, 4  ;;  %v1314_v26 = vrot.slane %v1312_v21, 5 }
  0x68   : > { %v1317_v27 = vrot.slane %v1315_v8, 6  ;;  %v1323_v28 = vrot.slane %v1321_v20, 5  ;;  %v1324_v29 = vshll.u32 %v1160_v4, 16  ;;  %v1310_v31 = vsel %vm4163_vm12, %v1301_v16, %v1309_v11  ;;  %v1167_v11 = vld [vmem:[%s3943_s27 + $0x5c] sm:$0x3] }
  0x69   : > { %v1678_v32 = vsel %vm4157_vm11, %v1676_v24, %v1677_v14  ;;  %v1331_v33 = vshrl.u32 %v1161_v18, 16  ;;  %v1334_v34 = vshll.u32 %v1161_v18, 16  ;;  %v3476_v13 = vcombine.low %v1300_v22, %v1310_v31  ;;  %v1166_v14 = vld [vmem:[%s3943_s27 + $0x58] sm:$0xf] }
  0x6a   : > { %v3501_v37 = vcombine.low %v1675_v19, %v1678_v32  ;;  %v1318_v38 = vor.u32 %v1317_v27, %v1314_v26  ;;  %v1326_v39 = vrot.slane %v1324_v29, 6  ;;  %v3493_v43 = vrot.slane %v1608_v25, 10  ;;  %v1614_v29 = vld [vmem:[%s3943_s27 + $0x54] sm:$0xc] }
  0x6b   : > { %v1333_v41 = vrot.slane %v1331_v33, 5  ;;  %v1336_v42 = vrot.slane %v1334_v34, 6  ;;  %v1681_v44 = vrot.slane %v1609_v30, 6  ;;  %3747 = vmatprep.mubr.msk.bf16.mxu1 %vm264_vm1, %v3476_v13  ;;  %v1684_v48 = vrot.slane %v1610_v35, 6  ;;  %v1615_v34 = vld [vmem:[%s3943_s27 + $0x58] sm:$0xf] }
  0x6c   : > { %3765 = vmatprep.mubr.msk.bf16.mxu0 %vm264_vm1, %v3501_v37  ;;  %v1319_v46 = vrot.slane %v1318_v38, 4  ;;  %v1327_v47 = vor.u32 %v1326_v39, %v1323_v28  ;;  %v1340_v50 = vshrl.u32 %v1162_v36, 16  ;;  %v1343_v53 = vshll.u32 %v1162_v36, 16  ;;  %v1616_v38 = vld [vmem:[%s3943_s27 + $0x5c] sm:$0x3] }
  0x6d   : > { %v1337_v51 = vor.u32 %v1336_v42, %v1333_v41  ;;  %v1682_v52 = vsel %vm4157_vm11, %v3493_v43, %v1681_v44  ;;  %v1683_v54 = vrot.slane %v1681_v44, 4  ;;  %v1349_v60 = vshrl.u32 %v1163_v45, 16  ;;  %v1898_v44 = vld [vmem:[%s3943_s27] sm:$0xc] }
  0x6e   : > { %v1328_v57 = vsel %vm4163_vm12, %v1319_v46, %v1327_v47  ;;  %v1329_v58 = vrot.slane %v1327_v47, 4  ;;  %v1342_v59 = vrot.slane %v1340_v50, 5  ;;  %v1345_v63 = vrot.slane %v1343_v53, 6 }
  0x6f   : > { %v1685_v62 = vsel %vm4157_vm11, %v1683_v54, %v1684_v48  ;;  %v1352_v0 = vshll.u32 %v1163_v45, 16  ;;  %v1359_v1 = vshrl.u32 %v1164_v49, 16  ;;  %v1351_v15 = vrot.slane %v1349_v60, 5  ;;  %v1899_v45 = vld [vmem:[%s3943_s27 + $0x4] sm:$0xf] }
  0x70   : > { %v1338_v3 = vsel %vm4163_vm12, %v1329_v58, %v1337_v51  ;;  %v3502_v4 = vcombine.low %v1682_v52, %v1685_v62  ;;  %v1362_v17 = vshll.u32 %v1164_v49, 16  ;;  %v1346_v9 = vor.u32 %v1345_v63, %v1342_v59 }
  0x71   : > { %v3477_v7 = vcombine.low %v1328_v57, %v1338_v3  ;;  %v1354_v10 = vrot.slane %v1352_v0, 6  ;;  %v1361_v12 = vrot.slane %v1359_v1, 5  ;;  %v3494_v18 = vrot.slane %v1611_v56, 10  ;;  %v1900_v56 = vld [vmem:[%s3943_s27 + $0x8] sm:$0x7] }
  0x72   : > { %3766 = vmatmul.mubr.msk.bf16.gmra.mxu0 %vm264_vm1, %v3502_v4  ;;  %v1364_v16 = vrot.slane %v1362_v17, 6  ;;  %v1688_v21 = vrot.slane %v1612_v61, 6  ;;  %v1691_v8 = vrot.slane %v1613_v2, 6  ;;  %v1347_v20 = vrot.slane %v1346_v9, 4  ;;  %v2347_v0 = vld [vmem:[%s3943_s27] sm:$0x8] }
  0x73   : > { %3748 = vmatmul.mubr.msk.bf16.gmra.mxu1 %vm264_vm1, %v3477_v7  ;;  %v1355_v22 = vor.u32 %v1354_v10, %v1351_v15  ;;  %v1368_v19 = vshrl.u32 %v1165_v6, 16  ;;  %v1371_v24 = vshll.u32 %v1165_v6, 16  ;;  %v1377_v28 = vshrl.u32 %v1166_v14, 16  ;;  %v2348_v15 = vld [vmem:[%s3943_s27 + $0x4] sm:$0xf] }
  0x74   : > { %v1365_v25 = vor.u32 %v1364_v16, %v1361_v12  ;;  %v1689_v26 = vsel %vm4157_vm11, %v3494_v18, %v1688_v21  ;;  %v1690_v27 = vrot.slane %v1688_v21, 4  ;;  %v1380_v13 = vshll.u32 %v1166_v14, 16  ;;  %v2349_v10 = vld [vmem:[%s3943_s27 + $0x8] sm:$0x7] }
  0x75   : > { %v1356_v30 = vsel %vm4163_vm12, %v1347_v20, %v1355_v22  ;;  %v1357_v31 = vrot.slane %v1355_v22, 4  ;;  %v1370_v32 = vrot.slane %v1368_v19, 5  ;;  %v1373_v33 = vrot.slane %v1371_v24, 6  ;;  %v1903_v24 = vld [vmem:[%s3943_s27 + $0x14] sm:$0x7] }
  0x76   : > { %v1692_v35 = vsel %vm4157_vm11, %v1690_v27, %v1691_v8  ;;  %v1379_v36 = vrot.slane %v1377_v28, 5  ;;  %v1387_v37 = vshrl.u32 %v1167_v11, 16  ;;  %v1390_v43 = vshll.u32 %v1167_v11, 16  ;;  %v1901_v8 = vld [vmem:[%s3943_s27 + $0xc] sm:$0xc] }
  0x77   : > { %v1366_v39 = vsel %vm4163_vm12, %v1357_v31, %v1365_v25  ;;  %v3503_v41 = vcombine.low %v1689_v26, %v1692_v35  ;;  %v1374_v42 = vor.u32 %v1373_v33, %v1370_v32  ;;  %v1382_v47 = vrot.slane %v1380_v13, 6  ;;  %v2350_v33 = vld [vmem:[%s3943_s27 + $0xc] sm:$0x8] }
  0x78   : > { %v3478_v46 = vcombine.low %v1356_v30, %v1366_v39  ;;  %v1389_v48 = vrot.slane %v1387_v37, 5  ;;  %v3495_v49 = vrot.slane %v1614_v29, 10  ;;  %v1392_v51 = vrot.slane %v1390_v43, 6  ;;  %v2351_v37 = vld [vmem:[%s3943_s27 + $0x10] sm:$0xf] }
  0x79   : > { %3769 = vmatprep.mubr.msk.bf16.mxu0 %vm264_vm1, %v3503_v41  ;;  %v1375_v50 = vrot.slane %v1374_v42, 4  ;;  %v1695_v52 = vrot.slane %v1615_v34, 6  ;;  %v1698_v54 = vrot.slane %v1616_v38, 6  ;;  %v1383_v53 = vor.u32 %v1382_v47, %v1379_v36  ;;  %v2352_v38 = vld [vmem:[%s3943_s27 + $0x14] sm:$0x7] }
  0x7a   : > { %3751 = vmatprep.mubr.msk.bf16.mxu1 %vm264_vm1, %v3478_v46  ;;  %v1926_v57 = vshrl.u32 %v1898_v44, 16  ;;  %v1929_v58 = vshll.u32 %v1898_v44, 16  ;;  %v1935_v59 = vshrl.u32 %v1899_v45, 16  ;;  %v1393_v60 = vor.u32 %v1392_v51, %v1389_v48  ;;  %v1904_v48 = vld [vmem:[%s3943_s27 + $0x18] sm:$0xc] }
  0x7b   : > { %v1696_v61 = vsel %vm4157_vm11, %v3495_v49, %v1695_v52  ;;  %v1697_v62 = vrot.slane %v1695_v52, 4  ;;  %v1938_v63 = vshll.u32 %v1899_v45, 16  ;;  %v1384_v1 = vsel %vm4163_vm12, %v1375_v50, %v1383_v53 }
  0x7c   : > { %v1385_v2 = vrot.slane %v1383_v53, 4  ;;  %v1928_v3 = vrot.slane %v1926_v57, 6  ;;  %v1931_v4 = vrot.slane %v1929_v58, 7  ;;  %v1937_v6 = vrot.slane %v1935_v59, 6  ;;  %v1906_v53 = vld [vmem:[%s3943_s27 + $0x20] sm:$0x7] }
  0x7d   : > { %v1699_v17 = vsel %vm4157_vm11, %v1697_v62, %v1698_v54  ;;  %v1940_v7 = vrot.slane %v1938_v63, 7  ;;  %v1945_v9 = vshrl.u32 %v1900_v56, 16  ;;  %v1948_v21 = vshll.u32 %v1900_v56, 16  ;;  %v1905_v54 = vld [vmem:[%s3943_s27 + $0x1c] sm:$0xf] }
  0x7e   : > { %v1394_v12 = vsel %vm4163_vm12, %v1385_v2, %v1393_v60  ;;  %v3504_v14 = vcombine.low %v1696_v61, %v1699_v17  ;;  %v1932_v18 = vor.u32 %v1931_v4, %v1928_v3  ;;  %v3530_v19 = vrot.slane %v2347_v0, 11  ;;  %v2353_v4 = vld [vmem:[%s3943_s27 + $0x18] sm:$0x8] }
  0x7f   : > { %v3479_v20 = vcombine.low %v1384_v1, %v1394_v12  ;;  %v1941_v22 = vor.u32 %v1940_v7, %v1937_v6  ;;  %v1947_v11 = vrot.slane %v1945_v9, 6  ;;  %v1950_v26 = vrot.slane %v1948_v21, 7 }
  0x80   : > { %3770 = vmatmul.mubr.msk.bf16.gmra.mxu0 %vm264_vm1, %v3504_v14  ;;  %v1933_v25 = vrot.slane %v1932_v18, 4  ;;  %v2400_v27 = vrot.slane %v2348_v15, 7  ;;  %v2403_v28 = vrot.slane %v2349_v10, 7  ;;  %v1954_v30 = vshrl.u32 %v1901_v8, 16  ;;  %v2354_v15 = vld [vmem:[%s3943_s27 + $0x1c] sm:$0xf] }
  0x81   : > { %3752 = vmatmul.mubr.msk.bf16.gmra.mxu1 %vm264_vm1, %v3479_v20  ;;  %v1943_v29 = vrot.slane %v1941_v22, 4  ;;  %v1957_v31 = vshll.u32 %v1901_v8, 16  ;;  %v1963_v32 = vshrl.u32 %v1902_v55, 16  ;;  %v1951_v35 = vor.u32 %v1950_v26, %v1947_v11  ;;  %v2355_v10 = vld [vmem:[%s3943_s27 + $0x20] sm:$0x7] }
  0x82   : > { %v1942_v34 = vsel %vm4307_vm3, %v1933_v25, %v1941_v22  ;;  %v2401_v36 = vsel %vm4315_vm4, %v3530_v19, %v2400_v27  ;;  %v2402_v13 = vrot.slane %v2400_v27, 4  ;;  %v1956_v39 = vrot.slane %v1954_v30, 6  ;;  %v1907_v22 = vld [vmem:[%s3943_s27 + $0x24] sm:$0xc]  ;;  %v1908_v26 = vld [vmem:[%s3943_s27 + $0x28] sm:$0xf] }
  0x83   : > { %v1959_v41 = vrot.slane %v1957_v31, 7  ;;  %v1965_v42 = vrot.slane %v1963_v32, 6  ;;  %v1966_v43 = vshll.u32 %v1902_v55, 16  ;;  %v1952_v44 = vsel %vm4307_vm3, %v1943_v29, %v1951_v35  ;;  %v1909_v31 = vld [vmem:[%s3943_s27 + $0x2c] sm:$0x7] }
  0x84   : > { %v2404_v45 = vsel %vm4315_vm4, %v2402_v13, %v2403_v28  ;;  %v1973_v46 = vshrl.u32 %v1903_v24, 16  ;;  %v1976_v47 = vshll.u32 %v1903_v24, 16  ;;  %v3514_v49 = vcombine.low %v1942_v34, %v1952_v44 }
  0x85   : > { %v3539_v50 = vcombine.low %v2401_v36, %v2404_v45  ;;  %v1960_v51 = vor.u32 %v1959_v41, %v1956_v39  ;;  %v1968_v52 = vrot.slane %v1966_v43, 7  ;;  %v3531_v58 = vrot.slane %v2350_v33, 11  ;;  %v2356_v36 = vld [vmem:[%s3943_s27 + $0x24] sm:$0x8]  ;;  %v2357_v45 = vld [vmem:[%s3943_s27 + $0x28] sm:$0xf] }
  0x86   : > { %v1975_v56 = vrot.slane %v1973_v46, 6  ;;  %v1978_v57 = vrot.slane %v1976_v47, 7  ;;  %v2407_v59 = vrot.slane %v2351_v37, 7  ;;  %3775 = vmatprep.mubr.msk.bf16.mxu1 %vm264_vm1, %v3514_v49  ;;  %v2410_v62 = vrot.slane %v2352_v38, 7  ;;  %v2358_v49 = vld [vmem:[%s3943_s27 + $0x2c] sm:$0x7] }
  0x87   : > { %3793 = vmatprep.mubr.msk.bf16.mxu0 %vm264_vm1, %v3539_v50  ;;  %v1961_v60 = vrot.slane %v1960_v51, 4  ;;  %v1969_v61 = vor.u32 %v1968_v52, %v1965_v42  ;;  %v3136_v63 = vsel %vm289_vm0, %v4239_v5, 0  ;;  %v1982_v3 = vshrl.u32 %v1904_v48, 16  ;;  %v1910_v50 = vld [vmem:[%s3943_s27 + $0x30] sm:$0xc] }
  0x88   : > { %v1979_v0 = vor.u32 %v1978_v57, %v1975_v56  ;;  %v2408_v1 = vsel %vm4315_vm4, %v3531_v58, %v2407_v59  ;;  %v2409_v2 = vrot.slane %v2407_v59, 4  ;;  %v1985_v7 = vshll.u32 %v1904_v48, 16 }
  0x89   : > { %v1970_v17 = vsel %vm4307_vm3, %v1961_v60, %v1969_v61  ;;  %v1971_v6 = vrot.slane %v1969_v61, 4  ;;  %v1991_v9 = vshrl.u32 %v1905_v54, 16  ;;  %v1984_v12 = vrot.slane %v1982_v3, 6  ;;  %v1911_v60 = vld [vmem:[%s3943_s27 + $0x34] sm:$0xf] }
  0x8a   : > { %v2411_v5 = vsel %vm4315_vm4, %v2409_v2, %v2410_v62  ;;  %v1994_v14 = vshll.u32 %v1905_v54, 16  ;;  %v2001_v18 = vshrl.u32 %v1906_v53, 16  ;;  %v1987_v55 = vrot.slane %v1985_v7, 7 }
  0x8b   : > { %v1980_v21 = vsel %vm4307_vm3, %v1971_v6, %v1979_v0  ;;  %v3540_v8 = vcombine.low %v2408_v1, %v2411_v5  ;;  %v1993_v20 = vrot.slane %v1991_v9, 6  ;;  %v2004_v25 = vshll.u32 %v1906_v53, 16  ;;  %v1912_v1 = vld [vmem:[%s3943_s27 + $0x38] sm:$0x7] }
  0x8c   : > { %v3515_v11 = vcombine.low %v1970_v17, %v1980_v21  ;;  %v1996_v19 = vrot.slane %v1994_v14, 7  ;;  %v2003_v24 = vrot.slane %v2001_v18, 6  ;;  %v1988_v27 = vor.u32 %v1987_v55, %v1984_v12  ;;  %v2359_v17 = vld [vmem:[%s3943_s27 + $0x30] sm:$0x8]  ;;  %v2360_v21 = vld [vmem:[%s3943_s27 + $0x34] sm:$0xf] }
  0x8d   : > { %3794 = vmatmul.mubr.msk.bf16.vlgmr.msra.gmra.mxu0 %vm264_vm1, %v3540_v8  ;;  %v3532_v28 = vrot.slane %v2353_v4, 11  ;;  %v2414_v29 = vrot.slane %v2354_v15, 7  ;;  %v2417_v30 = vrot.slane %v2355_v10, 7  ;;  %v2006_v33 = vrot.slane %v2004_v25, 7 }
  0x8e   : > { %3776 = vmatmul.mubr.msk.bf16.vlgmr.msra.gmra.mxu1 %vm264_vm1, %v3515_v11  ;;  %3828 = vmatpush3.bf16.msra.mxu0 %v3136_v63  ;;  %v1997_v32 = vor.u32 %v1996_v19, %v1993_v20  ;;  %v2010_v34 = vshrl.u32 %v1907_v22, 16  ;;  %v2013_v35 = vshll.u32 %v1907_v22, 16  ;;  %v1989_v13 = vrot.slane %v1988_v27, 4  ;;  %v2361_v11 = vld [vmem:[%s3943_s27 + $0x38] sm:$0x7] }
  0x8f   : > { %3810 = vmatpush3.bf16.msra.mxu1 %v3999_v23  ;;  %v2415_v37 = vsel %vm4315_vm4, %v3532_v28, %v2414_v29  ;;  %v2416_v38 = vrot.slane %v2414_v29, 4  ;;  %v2019_v39 = vshrl.u32 %v1908_v26, 16  ;;  %v2007_v42 = vor.u32 %v2006_v33, %v2003_v24  ;;  %v1913_v27 = vld [vmem:[%s3943_s27 + $0x3c] sm:$0xc] }
  0x90   : > { %v1999_v41 = vrot.slane %v1997_v32, 4  ;;  %v2012_v43 = vrot.slane %v2010_v34, 6  ;;  %v2015_v44 = vrot.slane %v2013_v35, 7  ;;  %v1998_v46 = vsel %vm4307_vm3, %v1989_v13, %v1997_v32  ;;  %v1914_v32 = vld [vmem:[%s3943_s27 + $0x40] sm:$0xf] }
  0x91   : > { %v2418_v47 = vsel %vm4315_vm4, %v2416_v38, %v2417_v30  ;;  %v2021_v48 = vrot.slane %v2019_v39, 6  ;;  %v2022_v23 = vshll.u32 %v1908_v26, 16  ;;  %v2029_v53 = vshrl.u32 %v1909_v31, 16  ;;  %v1915_v38 = vld [vmem:[%s3943_s27 + $0x44] sm:$0x7] }
  0x92   : > { %v2008_v51 = vsel %vm4307_vm3, %v1999_v41, %v2007_v42  ;;  %v3541_v52 = vcombine.low %v2415_v37, %v2418_v47  ;;  %v2016_v54 = vor.u32 %v2015_v44, %v2012_v43  ;;  %v2032_v58 = vshll.u32 %v1909_v31, 16 }
  0x93   : > { %v3516_v56 = vcombine.low %v1998_v46, %v2008_v51  ;;  %v2024_v57 = vrot.slane %v2022_v23, 7  ;;  %v3533_v59 = vrot.slane %v2356_v36, 11  ;;  %v2031_v62 = vrot.slane %v2029_v53, 6  ;;  %v2362_v46 = vld [vmem:[%s3943_s27 + $0x3c] sm:$0x8] }
  0x94   : > { %3797 = vmatprep.mubr.msk.bf16.mxu0 %vm264_vm1, %v3541_v52  ;;  %v2017_v61 = vrot.slane %v2016_v54, 4  ;;  %v2421_v63 = vrot.slane %v2357_v45, 7  ;;  %v2424_v0 = vrot.slane %v2358_v49, 7  ;;  %v2034_v3 = vrot.slane %v2032_v58, 7 }
  0x95   : > { %3779 = vmatprep.mubr.msk.bf16.mxu1 %vm264_vm1, %v3516_v56  ;;  %v2025_v2 = vor.u32 %v2024_v57, %v2021_v48  ;;  %v2038_v4 = vshrl.u32 %v1910_v50, 16  ;;  %v2041_v15 = vshll.u32 %v1910_v50, 16  ;;  %v2047_v9 = vshrl.u32 %v1911_v60, 16  ;;  %v2363_v50 = vld [vmem:[%s3943_s27 + $0x40] sm:$0xf] }
  0x96   : > { %v2422_v6 = vsel %vm4315_vm4, %v3533_v59, %v2421_v63  ;;  %v2423_v7 = vrot.slane %v2421_v63, 4  ;;  %v2050_v10 = vshll.u32 %v1911_v60, 16  ;;  %v2035_v14 = vor.u32 %v2034_v3, %v2031_v62  ;;  %v2364_v56 = vld [vmem:[%s3943_s27 + $0x44] sm:$0x7]  ;;  %v1916_v57 = vld [vmem:[%s3943_s27 + $0x48] sm:$0xc] }
  0x97   : > { %v2026_v5 = vsel %vm4307_vm3, %v2017_v61, %v2025_v2  ;;  %v2027_v12 = vrot.slane %v2025_v2, 4  ;;  %v2040_v18 = vrot.slane %v2038_v4, 6  ;;  %v2043_v55 = vrot.slane %v2041_v15, 7  ;;  %v1917_v2 = vld [vmem:[%s3943_s27 + $0x4c] sm:$0xf] }
  0x98   : > { %v2425_v8 = vsel %vm4315_vm4, %v2423_v7, %v2424_v0  ;;  %v2049_v20 = vrot.slane %v2047_v9, 6  ;;  %v2052_v22 = vrot.slane %v2050_v10, 7  ;;  %v2057_v25 = vshrl.u32 %v1912_v1, 16  ;;  %v1918_v10 = vld [vmem:[%s3943_s27 + $0x50] sm:$0x7] }
  0x99   : > { %v2036_v19 = vsel %vm4307_vm3, %v2027_v12, %v2035_v14  ;;  %v3542_v24 = vcombine.low %v2422_v6, %v2425_v8  ;;  %v2060_v26 = vshll.u32 %v1912_v1, 16  ;;  %v2044_v29 = vor.u32 %v2043_v55, %v2040_v18  ;;  %v2365_v8 = vld [vmem:[%s3943_s27 + $0x48] sm:$0x8] }
  0x9a   : > { %v3517_v28 = vcombine.low %v2026_v5, %v2036_v19  ;;  %v2053_v30 = vor.u32 %v2052_v22, %v2049_v20  ;;  %v3534_v31 = vrot.slane %v2359_v17, 11  ;;  %v2059_v33 = vrot.slane %v2057_v25, 6  ;;  %v2366_v19 = vld [vmem:[%s3943_s27 + $0x4c] sm:$0xf] }
  0x9b   : > { %3798 = vmatmul.mubr.msk.bf16.gmra.mxu0 %vm264_vm1, %v3542_v24  ;;  %v2062_v34 = vrot.slane %v2060_v26, 7  ;;  %v2428_v35 = vrot.slane %v2360_v21, 7  ;;  %v2431_v36 = vrot.slane %v2361_v11, 7  ;;  %v2045_v13 = vrot.slane %v2044_v29, 4  ;;  %v2367_v24 = vld [vmem:[%s3943_s27 + $0x50] sm:$0x7] }
  0x9c   : > { %3780 = vmatmul.mubr.msk.bf16.gmra.mxu1 %vm264_vm1, %v3517_v28  ;;  %v2055_v37 = vrot.slane %v2053_v30, 4  ;;  %v2066_v39 = vshrl.u32 %v1913_v27, 16  ;;  %v2069_v41 = vshll.u32 %v1913_v27, 16  ;;  %v2075_v45 = vshrl.u32 %v1914_v32, 16  ;;  %v1919_v29 = vld [vmem:[%s3943_s27 + $0x54] sm:$0xc] }
  0x9d   : > { %v2063_v42 = vor.u32 %v2062_v34, %v2059_v33  ;;  %v2429_v43 = vsel %vm4315_vm4, %v3534_v31, %v2428_v35  ;;  %v2430_v44 = vrot.slane %v2428_v35, 4  ;;  %v2054_v47 = vsel %vm4307_vm3, %v2045_v13, %v2053_v30 }
  0x9e   : > { %v2068_v48 = vrot.slane %v2066_v39, 6  ;;  %v2071_v23 = vrot.slane %v2069_v41, 7  ;;  %v2078_v49 = vshll.u32 %v1914_v32, 16  ;;  %v2077_v54 = vrot.slane %v2075_v45, 6 }
  0x9f   : > { %v2064_v51 = vsel %vm4307_vm3, %v2055_v37, %v2063_v42  ;;  %v2432_v52 = vsel %vm4315_vm4, %v2430_v44, %v2431_v36  ;;  %v2085_v53 = vshrl.u32 %v1915_v38, 16  ;;  %v2088_v63 = vshll.u32 %v1915_v38, 16  ;;  %v1920_v37 = vld [vmem:[%s3943_s27 + $0x58] sm:$0xf]  ;;  %v1921_v42 = vld [vmem:[%s3943_s27 + $0x5c] sm:$0x7] }
  0xa0   : > { %v3518_v58 = vcombine.low %v2054_v47, %v2064_v51  ;;  %v3543_v59 = vcombine.low %v2429_v43, %v2432_v52  ;;  %v2072_v60 = vor.u32 %v2071_v23, %v2068_v48  ;;  %v2080_v61 = vrot.slane %v2078_v49, 7  ;;  %v2368_v48 = vld [vmem:[%s3943_s27 + $0x54] sm:$0x8]  ;;  %v2369_v52 = vld [vmem:[%s3943_s27 + $0x58] sm:$0xf] }
  0xa1   : > { %v2087_v62 = vrot.slane %v2085_v53, 6  ;;  %v3535_v0 = vrot.slane %v2362_v46, 11  ;;  %v2435_v1 = vrot.slane %v2363_v50, 7  ;;  %v2438_v15 = vrot.slane %v2364_v56, 7 }
  0xa2   : > { %3783 = vmatprep.mubr.msk.bf16.mxu1 %vm264_vm1, %v3518_v58  ;;  %3801 = vmatprep.mubr.msk.bf16.mxu0 %vm264_vm1, %v3543_v59  ;;  %v2073_v3 = vrot.slane %v2072_v60, 4  ;;  %v2081_v4 = vor.u32 %v2080_v61, %v2077_v54  ;;  %v2094_v17 = vshrl.u32 %v1916_v57, 16  ;;  %v2090_v6 = vrot.slane %v2088_v63, 7  ;;  %v2370_v58 = vld [vmem:[%s3943_s27 + $0x5c] sm:$0x7] }
  0xa3   : > { %v2436_v7 = vsel %vm4315_vm4, %v3535_v0, %v2435_v1  ;;  %v2437_v9 = vrot.slane %v2435_v1, 4  ;;  %v2097_v5 = vshll.u32 %v1916_v57, 16  ;;  %v2103_v21 = vshrl.u32 %v1917_v2, 16 }
  0xa4   : > { %v2082_v12 = vsel %vm4307_vm3, %v2073_v3, %v2081_v4  ;;  %v2083_v14 = vrot.slane %v2081_v4, 4  ;;  %v2096_v18 = vrot.slane %v2094_v17, 6  ;;  %v2091_v55 = vor.u32 %v2090_v6, %v2087_v62  ;;  %v2652_v3 = vld [vmem:[%s3943_s27] sm:$0x8]  ;;  %v2653_v4 = vld [vmem:[%s3943_s27 + $0x4] sm:$0xf] }
  0xa5   : > { %v2439_v20 = vsel %vm4315_vm4, %v2437_v9, %v2438_v15  ;;  %v2099_v22 = vrot.slane %v2097_v5, 7  ;;  %v2106_v11 = vshll.u32 %v1917_v2, 16  ;;  %v2105_v26 = vrot.slane %v2103_v21, 6  ;;  %v2654_v9 = vld [vmem:[%s3943_s27 + $0x8] sm:$0xf] }
  0xa6   : > { %v3544_v25 = vcombine.low %v2436_v7, %v2439_v20  ;;  %v2113_v27 = vshrl.u32 %v1918_v10, 16  ;;  %v2116_v28 = vshll.u32 %v1918_v10, 16  ;;  %v2092_v30 = vsel %vm4307_vm3, %v2083_v14, %v2091_v55 }
  0xa7   : > { %v2100_v31 = vor.u32 %v2099_v22, %v2096_v18  ;;  %v2108_v32 = vrot.slane %v2106_v11, 7  ;;  %v3536_v33 = vrot.slane %v2365_v8, 11  ;;  %v3519_v34 = vcombine.low %v2082_v12, %v2092_v30  ;;  %v2655_v8 = vld [vmem:[%s3943_s27 + $0xc] sm:$0x8] }
  0xa8   : > { %3802 = vmatmul.mubr.msk.bf16.gmra.mxu0 %vm264_vm1, %v3544_v25  ;;  %v2115_v35 = vrot.slane %v2113_v27, 6  ;;  %v2118_v36 = vrot.slane %v2116_v28, 7  ;;  %v2442_v13 = vrot.slane %v2366_v19, 7  ;;  %v2445_v41 = vrot.slane %v2367_v24, 7  ;;  %v2656_v19 = vld [vmem:[%s3943_s27 + $0x10] sm:$0xf] }
  0xa9   : > { %v2101_v38 = vrot.slane %v2100_v31, 4  ;;  %v2109_v39 = vor.u32 %v2108_v32, %v2105_v26  ;;  %v2122_v43 = vshrl.u32 %v1919_v29, 16  ;;  %3784 = vmatmul.mubr.msk.bf16.gmra.mxu1 %vm264_vm1, %v3519_v34  ;;  %v2125_v47 = vshll.u32 %v1919_v29, 16  ;;  %v3874_v28 = vld [vmem:[%s3943_s27 + $0x4] sm:$0xff]   ;;  %v2657_v29 = vld [vmem:[%s3943_s27 + $0x14] sm:$0xf] }
  0xaa   : > { %v2119_v44 = vor.u32 %v2118_v36, %v2115_v35  ;;  %v2443_v45 = vsel %vm4315_vm4, %v3536_v33, %v2442_v13  ;;  %v2444_v46 = vrot.slane %v2442_v13, 4  ;;  %v2131_v51 = vshrl.u32 %v1920_v37, 16  ;;  %v2658_v34 = vld [vmem:[%s3943_s27 + $0x18] sm:$0x8] }
  0xab   : > { %v2110_v23 = vsel %vm4307_vm3, %v2101_v38, %v2109_v39  ;;  %v2111_v49 = vrot.slane %v2109_v39, 4  ;;  %v2124_v50 = vrot.slane %v2122_v43, 6  ;;  %v2127_v53 = vrot.slane %v2125_v47, 7  ;;  %v2659_v38 = vld [vmem:[%s3943_s27 + $0x1c] sm:$0xf] }
  0xac   : > { %v2446_v54 = vsel %vm4315_vm4, %v2444_v46, %v2445_v41  ;;  %v2134_v56 = vshll.u32 %v1920_v37, 16  ;;  %v2141_v57 = vshrl.u32 %v1921_v42, 16  ;;  %v2133_v61 = vrot.slane %v2131_v51, 6  ;;  %v2660_v43 = vld [vmem:[%s3943_s27 + $0x20] sm:$0xf] }
  0xad   : > { %v2120_v59 = vsel %vm4307_vm3, %v2111_v49, %v2119_v44  ;;  %v3545_v60 = vcombine.low %v2443_v45, %v2446_v54  ;;  %v2144_v62 = vshll.u32 %v1921_v42, 16  ;;  %v2128_v0 = vor.u32 %v2127_v53, %v2124_v50 }
  0xae   : > { %v3520_v63 = vcombine.low %v2110_v23, %v2120_v59  ;;  %v2136_v1 = vrot.slane %v2134_v56, 7  ;;  %v2143_v2 = vrot.slane %v2141_v57, 6  ;;  %v3537_v17 = vrot.slane %v2368_v48, 11  ;;  %v2661_v48 = vld [vmem:[%s3943_s27 + $0x24] sm:$0x8] }
  0xaf   : > { %3805 = vmatprep.mubr.msk.bf16.mxu0 %vm264_vm1, %v3545_v60  ;;  %v2146_v15 = vrot.slane %v2144_v62, 7  ;;  %v2449_v6 = vrot.slane %v2369_v52, 7  ;;  %v2452_v7 = vrot.slane %v2370_v58, 7  ;;  %v2129_v10 = vrot.slane %v2128_v0, 4  ;;  %v2662_v52 = vld [vmem:[%s3943_s27 + $0x28] sm:$0xf] }
  0xb0   : > { %3787 = vmatprep.mubr.msk.bf16.mxu1 %vm264_vm1, %v3520_v63  ;;  %v2137_v5 = vor.u32 %v2136_v1, %v2133_v61  ;;  %vm2676_vm0 = vsmask.f32 256  ;;  %v2680_v21 = vshrl.u32 %v2652_v3, 16  ;;  %v2685_v22 = vshrl.u32 %v2653_v4, 16  ;;  %v3875_v60 = vld [vmem:[%s3943_s27 + $0x10] sm:$0xff]   ;;  %v3876_v1 = vld [vmem:[%s3943_s27 + $0x1c] sm:$0xff]  }
  0xb1   : > { %v2147_v12 = vor.u32 %v2146_v15, %v2143_v2  ;;  %v2450_v14 = vsel %vm4315_vm4, %v3537_v17, %v2449_v6  ;;  %v2451_v18 = vrot.slane %v2449_v6, 4  ;;  %v2688_v11 = vshll.u32 %v2653_v4, 16  ;;  %vm4452_vm6 = vmor %vm2676_vm0, %vm2677_vm5  ;;  %v2663_v2 = vld [vmem:[%s3943_s27 + $0x2c] sm:$0xf] }
  0xb2   : > { %v2138_v55 = vsel %vm4307_vm3, %v2129_v10, %v2137_v5  ;;  %v2139_v20 = vrot.slane %v2137_v5, 4  ;;  %v3555_v25 = vrot.slane %v2680_v21, 11  ;;  %v2694_v26 = vshrl.u32 %v2654_v9, 16  ;;  %v2665_v10 = vld [vmem:[%s3943_s27 + $0x34] sm:$0xf] }
  0xb3   : > { %v2453_v24 = vsel %vm4315_vm4, %v2451_v18, %v2452_v7  ;;  %v2697_v27 = vshll.u32 %v2654_v9, 16  ;;  %v2687_v32 = vrot.slane %v2685_v22, 7  ;;  %v2702_v33 = vshrl.u32 %v2655_v8, 16  ;;  %v2664_v9 = vld [vmem:[%s3943_s27 + $0x30] sm:$0x8] }
  0xb4   : > { %v2148_v30 = vsel %vm4307_vm3, %v2139_v20, %v2147_v12  ;;  %v3546_v31 = vcombine.low %v2450_v14, %v2453_v24  ;;  %v2696_v36 = vrot.slane %v2694_v26, 7  ;;  %v2707_v13 = vshrl.u32 %v2656_v19, 16  ;;  %v2666_v21 = vld [vmem:[%s3943_s27 + $0x38] sm:$0xf]  ;;  %v2667_v26 = vld [vmem:[%s3943_s27 + $0x3c] sm:$0x8] }
  0xb5   : > { %v3521_v35 = vcombine.low %v2138_v55, %v2148_v30  ;;  %v2710_v37 = vshll.u32 %v2656_v19, 16  ;;  %v2690_v16 = vor.u32 %v2688_v11, %v2687_v32  ;;  %v2692_v39 = vrot.slane %v2687_v32, 4 }
  0xb6   : > { %3806 = vmatmul.mubr.msk.bf16.gmra.mxu0 %vm264_vm1, %v3546_v31  ;;  %v3556_v41 = vrot.slane %v2702_v33, 11  ;;  %v2716_v42 = vshrl.u32 %v2657_v29, 16  ;;  %v2699_v44 = vor.u32 %v2697_v27, %v2696_v36  ;;  %v2709_v45 = vrot.slane %v2707_v13, 7  ;;  %v2668_v31 = vld [vmem:[%s3943_s27 + $0x40] sm:$0xf] }
  0xb7   : > { %3788 = vmatmul.mubr.msk.bf16.gmra.mxu1 %vm264_vm1, %v3521_v35  ;;  %3829 = vmatprep.mubr.msk.bf16.mxu0 %vm264_vm1, %v3874_v28  ;;  %v2719_v46 = vshll.u32 %v2657_v29, 16  ;;  %v2724_v47 = vshrl.u32 %v2658_v34, 16  ;;  %v2691_v23 = vsel %vm4452_vm6, %v3555_v25, %v2690_v16  ;;  %v2729_v50 = vshrl.u32 %v2659_v38, 16  ;;  %v2669_v36 = vld [vmem:[%s3943_s27 + $0x44] sm:$0xf] }
  0xb8   : > { %v2718_v49 = vrot.slane %v2716_v42, 7  ;;  %v2732_v51 = vshll.u32 %v2659_v38, 16  ;;  %v2700_v54 = vsel %vm4452_vm6, %v2692_v39, %v2699_v44  ;;  %v2712_v53 = vor.u32 %v2710_v37, %v2709_v45  ;;  %v3877_v37 = vld [vmem:[%s3943_s27 + $0x28] sm:$0xff]   ;;  %v3878_v44 = vld [vmem:[%s3943_s27 + $0x34] sm:$0xff]  }
  0xb9   : > { %v2714_v56 = vrot.slane %v2709_v45, 4  ;;  %v3557_v57 = vrot.slane %v2724_v47, 11  ;;  %v3564_v58 = vcombine.low %v2691_v23, %v2700_v54  ;;  %v2731_v61 = vrot.slane %v2729_v50, 7  ;;  %v2671_v47 = vld [vmem:[%s3943_s27 + $0x4c] sm:$0xf] }
  0xba   : > { %v2721_v59 = vor.u32 %v2719_v46, %v2718_v49  ;;  %v2738_v62 = vshrl.u32 %v2660_v43, 16  ;;  %v2713_v63 = vsel %vm4452_vm6, %v3556_v41, %v2712_v53  ;;  %v2741_v0 = vshll.u32 %v2660_v43, 16  ;;  %v2670_v41 = vld [vmem:[%s3943_s27 + $0x48] sm:$0x8] }
  0xbb   : > { %v2746_v3 = vshrl.u32 %v2661_v48, 16  ;;  %v2751_v4 = vshrl.u32 %v2662_v52, 16  ;;  %3811 = vmatprep.mubr.msk.bf16.mxu1 %vm264_vm1, %v3564_v58  ;;  %v2734_v17 = vor.u32 %v2732_v51, %v2731_v61  ;;  %v2736_v6 = vrot.slane %v2731_v61, 4 }
  0xbc   : > { %v2722_v15 = vsel %vm4452_vm6, %v2714_v56, %v2721_v59  ;;  %v2740_v7 = vrot.slane %v2738_v62, 7  ;;  %v2754_v18 = vshll.u32 %v2662_v52, 16  ;;  %v2760_v20 = vshrl.u32 %v2663_v2, 16  ;;  %v2672_v56 = vld [vmem:[%s3943_s27 + $0x50] sm:$0xf] }
  0xbd   : > { %v3565_v5 = vcombine.low %v2713_v63, %v2722_v15  ;;  %v3558_v12 = vrot.slane %v2746_v3, 11  ;;  %v2753_v14 = vrot.slane %v2751_v4, 7  ;;  %v2735_v8 = vsel %vm4452_vm6, %v3557_v57, %v2734_v17  ;;  %v2673_v57 = vld [vmem:[%s3943_s27 + $0x54] sm:$0x8]  ;;  %v2674_v62 = vld [vmem:[%s3943_s27 + $0x58] sm:$0xf] }
  0xbe   : > { %3830 = vmatmul.mubr.msk.bf16.vlgmr.msra.gmra.mxu0 %vm264_vm1, %v3875_v60  ;;  %v2743_v55 = vor.u32 %v2741_v0, %v2740_v7  ;;  %v2763_v22 = vshll.u32 %v2663_v2, 16  ;;  %v2768_v24 = vshrl.u32 %v2664_v9, 16  ;;  %v2773_v25 = vshrl.u32 %v2665_v10, 16  ;;  %v2675_v9 = vld [vmem:[%s3943_s27 + $0x5c] sm:$0xf] }
  0xbf   : > { %3812 = vmatmul.mubr.msk.bf16.vlgmr.msra.gmra.mxu1 %vm264_vm1, %v3565_v5  ;;  %3833 = vmatprep.mubr.msk.bf16.mxu0 %vm264_vm1, %v3876_v1  ;;  %v2756_v11 = vor.u32 %v2754_v18, %v2753_v14  ;;  %v2758_v19 = vrot.slane %v2753_v14, 4  ;;  %v2762_v28 = vrot.slane %v2760_v20, 7  ;;  %v2776_v29 = vshll.u32 %v2665_v10, 16  ;;  %v3879_v14 = vld [vmem:[%s3943_s27 + $0x40] sm:$0xff]   ;;  %v3880_v20 = vld [vmem:[%s3943_s27 + $0x4c] sm:$0xff]  }
  0xc0   : > { %v2744_v27 = vsel %vm4452_vm6, %v2736_v6, %v2743_v55  ;;  %v2782_v30 = vshrl.u32 %v2666_v21, 16  ;;  %v3559_v34 = vrot.slane %v2768_v24, 11  ;;  %v2775_v35 = vrot.slane %v2773_v25, 7 }
  0xc1   : > { %v3566_v32 = vcombine.low %v2735_v8, %v2744_v27  ;;  %v2757_v33 = vsel %vm4452_vm6, %v3558_v12, %v2756_v11  ;;  %v2765_v13 = vor.u32 %v2763_v22, %v2762_v28  ;;  %v2785_v16 = vshll.u32 %v2666_v21, 16 }
  0xc2   : > { %v2784_v38 = vrot.slane %v2782_v30, 7  ;;  %v2790_v39 = vshrl.u32 %v2667_v26, 16  ;;  %v2778_v42 = vor.u32 %v2776_v29, %v2775_v35  ;;  %v2780_v43 = vrot.slane %v2775_v35, 4 }
  0xc3   : > { %3815 = vmatprep.mubr.msk.bf16.mxu1 %vm264_vm1, %v3566_v32  ;;  %v2795_v45 = vshrl.u32 %v2668_v31, 16  ;;  %v2798_v46 = vshll.u32 %v2668_v31, 16  ;;  %v2766_v48 = vsel %vm4452_vm6, %v2758_v19, %v2765_v13  ;;  %v2804_v50 = vshrl.u32 %v2669_v36, 16  ;;  %v3881_v13 = vld [vmem:[%s3943_s27 + $0x58] sm:$0xff]  }
  0xc4   : > { %v2787_v23 = vor.u32 %v2785_v16, %v2784_v38  ;;  %v3560_v49 = vrot.slane %v2790_v39, 11  ;;  %v3567_v51 = vcombine.low %v2757_v33, %v2766_v48  ;;  %v2779_v52 = vsel %vm4452_vm6, %v3559_v34, %v2778_v42 }
  0xc5   : > { %v2797_v54 = vrot.slane %v2795_v45, 7  ;;  %v2807_v53 = vshll.u32 %v2669_v36, 16  ;;  %v2806_v59 = vrot.slane %v2804_v50, 7  ;;  %v2812_v60 = vshrl.u32 %v2670_v41, 16 }
  0xc6   : > { %3834 = vmatmul.mubr.msk.bf16.gmra.mxu0 %vm264_vm1, %v3877_v37  ;;  %v2788_v58 = vsel %vm4452_vm6, %v2780_v43, %v2787_v23  ;;  %v2817_v61 = vshrl.u32 %v2671_v47, 16  ;;  %v2820_v2 = vshll.u32 %v2671_v47, 16  ;;  %v2826_v17 = vshrl.u32 %v2672_v56, 16 }
  0xc7   : > { %3816 = vmatmul.mubr.msk.bf16.gmra.mxu1 %vm264_vm1, %v3567_v51  ;;  %v3568_v63 = vcombine.low %v2779_v52, %v2788_v58  ;;  %3837 = vmatprep.mubr.msk.bf16.mxu0 %vm264_vm1, %v3878_v44  ;;  %v2800_v0 = vor.u32 %v2798_v46, %v2797_v54  ;;  %v2802_v1 = vrot.slane %v2797_v54, 4  ;;  %v2809_v3 = vor.u32 %v2807_v53, %v2806_v59 }
  0xc8   : > { %v3561_v4 = vrot.slane %v2812_v60, 11  ;;  %v2819_v15 = vrot.slane %v2817_v61, 7  ;;  %v2829_v7 = vshll.u32 %v2672_v56, 16  ;;  %v2834_v10 = vshrl.u32 %v2673_v57, 16 }
  0xc9   : > { %3819 = vmatprep.mubr.msk.bf16.mxu1 %vm264_vm1, %v3568_v63  ;;  %v2801_v6 = vsel %vm4452_vm6, %v3560_v49, %v2800_v0  ;;  %v2839_v5 = vshrl.u32 %v2674_v62, 16  ;;  %v2810_v12 = vsel %vm4452_vm6, %v2802_v1, %v2809_v3  ;;  %v2828_v8 = vrot.slane %v2826_v17, 7 }
  0xca   : > { %v2822_v18 = vor.u32 %v2820_v2, %v2819_v15  ;;  %v2824_v21 = vrot.slane %v2819_v15, 4  ;;  %v3569_v55 = vcombine.low %v2801_v6, %v2810_v12  ;;  %v3562_v22 = vrot.slane %v2834_v10, 11 }
  0xcb   : > { %v2841_v11 = vrot.slane %v2839_v5, 7  ;;  %v2842_v19 = vshll.u32 %v2674_v62, 16  ;;  %v2831_v25 = vor.u32 %v2829_v7, %v2828_v8  ;;  %v2848_v26 = vshrl.u32 %v2675_v9, 16 }
  0xcc   : > { %v2823_v24 = vsel %vm4452_vm6, %v3561_v4, %v2822_v18  ;;  %v2851_v27 = vshll.u32 %v2675_v9, 16 }
  0xcd   : > { %v2844_v28 = vor.u32 %v2842_v19, %v2841_v11  ;;  %v2832_v29 = vsel %vm4452_vm6, %v2824_v21, %v2831_v25  ;;  %v2846_v30 = vrot.slane %v2841_v11, 4  ;;  %v2850_v31 = vrot.slane %v2848_v26, 7 }
  0xce   : > { %3838 = vmatmul.mubr.msk.bf16.gmra.mxu0 %vm264_vm1, %v3879_v14  ;;  %v3570_v32 = vcombine.low %v2823_v24, %v2832_v29 }
  0xcf   : > { %3820 = vmatmul.mubr.msk.bf16.gmra.mxu1 %vm264_vm1, %v3569_v55  ;;  %3841 = vmatprep.mubr.msk.bf16.mxu0 %vm264_vm1, %v3880_v20  ;;  %v2845_v33 = vsel %vm4452_vm6, %v3562_v22, %v2844_v28  ;;  %v2853_v34 = vor.u32 %v2851_v27, %v2850_v31 }
  0xd0   : > { %3823 = vmatprep.mubr.msk.bf16.mxu1 %vm264_vm1, %v3570_v32 }
  0xd1   : > { %v2854_v36 = vsel %vm4452_vm6, %v2846_v30, %v2853_v34 }
  0xd2   : > { %v3571_v38 = vcombine.low %v2845_v33, %v2854_v36 }
  0xd4   : > { %v3687_v35 = vpop.f32.mrf.mxu0  ;;  %v3695_v37 = vpop.f32.mrf.mxu1 }
  0xd6   : > { %v327_v16 = vpop.f32.mrf.mxu0  ;;  %v359_v39 = vpop.f32.mrf.mxu1  ;;  %3842 = vmatmul.mubr.msk.bf16.gmra.mxu0 %vm264_vm1, %v3881_v13 }
  0xd7   : > { %3824 = vmatmul.mubr.msk.bf16.gmra.mxu1 %vm264_vm1, %v3571_v38 }
  0xd8   : > { %v3688_v41 = vpop.f32.mrf.mxu0  ;;  %v3696_v42 = vpop.f32.mrf.mxu1 }
  0xda   : > { %v330_v43 = vpop.f32.mrf.mxu0  ;;  %v362_v44 = vpop.f32.mrf.mxu1 }
  0xdc   : > { %v3691_v45 = vpop.f32.mrf.mxu0  ;;  %v3699_v46 = vpop.f32.mrf.mxu1 }
  0xde   : > { %v343_v47 = vpop.f32.mrf.mxu0  ;;  %v375_v48 = vpop.f32.mrf.mxu1 }
  0xe0   : > { %v3692_v23 = vpop.f32.mrf.mxu0  ;;  %v3700_v40 = vpop.f32.mrf.mxu1 }
  0xe2   : > { %v346_v49 = vpop.f32.mrf.mxu0  ;;  %v378_v50 = vpop.f32.mrf.mxu1 }
  0xe5   : > { %v3705_v51 = vpop.f32.mrf.mxu1 }
  0xe6   : > { %v3723_v52 = vpop.f32.mrf.mxu0  ;;  %v793_v54 = vadd.f32 %v3705_v51, %v3687_v35 }
  0xe7   : > { %v728_v53 = vpop.f32.mrf.mxu1 }
  0xe8   : > { %v1033_v56 = vpop.f32.mrf.mxu0  ;;  %v4530_v57 = vadd.f32 %v3723_v52, %v793_v54  ;;  %v791_v58 = vadd.f32 %v728_v53, %v327_v16 }
  0xe9   : > { %v3706_v59 = vpop.f32.mrf.mxu1 }
  0xea   : > { %v3724_v60 = vpop.f32.mrf.mxu0  ;;  %v4532_v61 = vadd.f32 %v1033_v56, %v791_v58  ;;  %v794_v62 = vadd.f32 %v3706_v59, %v3688_v41 }
  0xeb   : > { %v731_v63 = vpop.f32.mrf.mxu1 }
  0xec   : > { %v4534_v0 = vadd.f32 %v3724_v60, %v794_v62  ;;  %v792_v1 = vadd.f32 %v731_v63, %v330_v43  ;;  %v1036_v2 = vpop.f32.mrf.mxu0 }
  0xee   : > { %v4536_v3 = vadd.f32 %v1036_v2, %v792_v1 }
  0xf2   : > { %v3709_v4 = vpop.f32.mrf.mxu1  ;;  %v3727_v15 = vpop.f32.mrf.mxu0 }
  0xf3   : > { %v797_v17 = vadd.f32 %v3709_v4, %v3691_v45 }
  0xf4   : > { %v744_v6 = vpop.f32.mrf.mxu1  ;;  %v1049_v7 = vpop.f32.mrf.mxu0 }
  0xf5   : > { %v4538_v9 = vadd.f32 %v3727_v15, %v797_v17  ;;  %v795_v10 = vadd.f32 %v744_v6, %v343_v47 }
  0xf6   : > { %v3710_v5 = vpop.f32.mrf.mxu1  ;;  %v3728_v12 = vpop.f32.mrf.mxu0 }
  0xf7   : > { %v4540_v14 = vadd.f32 %v1049_v7, %v795_v10  ;;  %v798_v18 = vadd.f32 %v3710_v5, %v3692_v23 }
  0xf8   : > { %v747_v21 = vpop.f32.mrf.mxu1  ;;  %v1052_v20 = vpop.f32.mrf.mxu0 }
  0xf9   : > { %v4542_v8 = vadd.f32 %v3728_v12, %v798_v18  ;;  %v796_v55 = vadd.f32 %v747_v21, %v346_v49 }
  0xfb   : > { %v4544_v22 = vadd.f32 %v1052_v20, %v796_v55 }
  0xfe   : > { %v3713_v11 = vpop.f32.mrf.mxu1  ;;  %v3731_v19 = vpop.f32.mrf.mxu0 }
  0xff   : > { %v801_v24 = vadd.f32 %v3713_v11, %v3695_v37 }
 0x100   : > { %v760_v25 = vpop.f32.mrf.mxu1  ;;  %v1065_v26 = vpop.f32.mrf.mxu0 }
 0x101   : > { %v4546_v27 = vadd.f32 %v3731_v19, %v801_v24  ;;  %v799_v28 = vadd.f32 %v760_v25, %v359_v39 }
 0x102   : > { %v3714_v29 = vpop.f32.mrf.mxu1  ;;  %v3732_v30 = vpop.f32.mrf.mxu0 }
 0x103   : > { %v4548_v31 = vadd.f32 %v1065_v26, %v799_v28  ;;  %v802_v32 = vadd.f32 %v3714_v29, %v3696_v42 }
 0x104   : > { %v763_v33 = vpop.f32.mrf.mxu1  ;;  %v1068_v36 = vpop.f32.mrf.mxu0 }
 0x105   : > { %v4550_v34 = vadd.f32 %v3732_v30, %v802_v32  ;;  %v800_v35 = vadd.f32 %v763_v33, %v362_v44 }
 0x107   : > { %v4552_v13 = vadd.f32 %v1068_v36, %v800_v35 }
 0x10a   : > { %v3717_v38 = vpop.f32.mrf.mxu1  ;;  %v3735_v16 = vpop.f32.mrf.mxu0 }
 0x10b   : > { %v805_v37 = vadd.f32 %v3717_v38, %v3699_v46 }
 0x10c   : > { %v776_v41 = vpop.f32.mrf.mxu1  ;;  %v1081_v43 = vpop.f32.mrf.mxu0 }
 0x10d   : > { %v4554_v45 = vadd.f32 %v3735_v16, %v805_v37  ;;  %v803_v39 = vadd.f32 %v776_v41, %v375_v48 }
 0x10e   : > { %v3718_v47 = vpop.f32.mrf.mxu1  ;;  %v3736_v23 = vpop.f32.mrf.mxu0 }
 0x10f   : > { %v4556_v49 = vadd.f32 %v1081_v43, %v803_v39  ;;  %v806_v42 = vadd.f32 %v3718_v47, %v3700_v40 }
 0x110   : > { %v779_v51 = vpop.f32.mrf.mxu1  ;;  %v1084_v54 = vpop.f32.mrf.mxu0 }
 0x111   : > { %4805 = vst [vmem:[#allocation3_spill] sm:$0xff] %v4556_v49  ;;  %v4558_v52 = vadd.f32 %v3736_v23, %v806_v42  ;;  %v804_v44 = vadd.f32 %v779_v51, %v378_v50 }
 0x113   : > { %4806 = vst [vmem:[#allocation4_spill] sm:$0xff] %v4558_v52  ;;  %v4560_v53 = vadd.f32 %v1084_v54, %v804_v44 }
 0x115   : > { %4807 = vst [vmem:[#allocation5_spill] sm:$0xff] %v4560_v53 }
 0x117   : > { %v3759_v56 = vpop.f32.mrf.mxu0 }
 0x118   : > { %v3741_v58 = vpop.f32.mrf.mxu1 }
 0x119   : > { %v1787_v46 = vpop.f32.mrf.mxu0 }
 0x11a   : > { %v1482_v59 = vpop.f32.mrf.mxu1 }
 0x11b   : > { %v4562_v60 = vpop.f32.mrf.mxu0  ;;  %v1545_v49 = vadd.f32 %v1482_v59, %v4532_v61 }
 0x11c   : > { %v3742_v62 = vpop.f32.mrf.mxu1 }
 0x11d   : > { %v4564_v48 = vpop.f32.mrf.mxu0 }
 0x11e   : > { %v1485_v63 = vpop.f32.mrf.mxu1 }
 0x125   : > { %v4566_v1 = vpop.f32.mrf.mxu0 }
 0x126   : > { %v3745_v40 = vpop.f32.mrf.mxu1 }
 0x127   : > { %v4568_v2 = vpop.f32.mrf.mxu0 }
 0x128   : > { %v1498_v4 = vpop.f32.mrf.mxu1 }
 0x129   : > { %v4570_v50 = vpop.f32.mrf.mxu0 }
 0x12a   : > { %v4572_v15 = vpop.f32.mrf.mxu1 }
 0x12b   : > { %v4574_v17 = vpop.f32.mrf.mxu0 }
 0x12c   : > { %v4576_v6 = vpop.f32.mrf.mxu1 }
 0x132   : > { %v4578_v7 = vpop.f32.mrf.mxu0 }
 0x133   : > { %v4580_v10 = vpop.f32.mrf.mxu1 }
 0x134   : > { %v4582_v5 = vpop.f32.mrf.mxu0 }
 0x135   : > { %v4584_v12 = vpop.f32.mrf.mxu1 }
 0x136   : > { %v4586_v18 = vpop.f32.mrf.mxu0 }
 0x137   : > { %v4588_v21 = vpop.f32.mrf.mxu1 }
 0x138   : > { %v4590_v55 = vpop.f32.mrf.mxu0 }
 0x139   : > { %4808 = vst [vmem:[#allocation6_spill] sm:$0xff] %v4590_v55  ;;  %v4592_v20 = vpop.f32.mrf.mxu1 }
 0x140   : > { %v4594_v11 = vpop.f32.mrf.mxu0 }
 0x141   : > { %4809 = vst [vmem:[#allocation7_spill] sm:$0xff] %v4594_v11  ;;  %v4596_v19 = vpop.f32.mrf.mxu1 }
 0x142   : > { %4810 = vst [vmem:[#allocation8_spill] sm:$0xff] %v4596_v19  ;;  %v4598_v24 = vpop.f32.mrf.mxu0 }
 0x143   : > { %4811 = vst [vmem:[#allocation9_spill] sm:$0xff] %v4598_v24  ;;  %v4600_v25 = vpop.f32.mrf.mxu1 }
 0x144   : > { %4812 = vst [vmem:[#allocation10_spill] sm:$0xff] %v4600_v25  ;;  %v4602_v26 = vpop.f32.mrf.mxu0  ;;  %v1547_v25 = vadd.f32 %v3741_v58, %v4530_v57  ;;  %v1551_v57 = vadd.f32 %v3745_v40, %v4538_v9  ;;  %v1552_v9 = vadd.f32 %v4572_v15, %v4542_v8 }
 0x145   : > { %4813 = vst [vmem:[#allocation11_spill] sm:$0xff] %v4602_v26  ;;  %v4604_v28 = vpop.f32.mrf.mxu1 }
 0x146   : > { %4814 = vst [vmem:[#allocation12_spill] sm:$0xff] %v4604_v28  ;;  %v4606_v29 = vpop.f32.mrf.mxu0 }
 0x147   : > { %4815 = vst [vmem:[#allocation13_spill] sm:$0xff] %v4606_v29  ;;  %v4608_v30 = vpop.f32.mrf.mxu1 }
 0x148   : > { %4816 = vst [vmem:[#allocation14_spill] sm:$0xff] %v4608_v30 }
 0x14d   : > { %v3795_v32 = vpop.f32.mrf.mxu0 }
 0x14e   : > { %v3777_v33 = vpop.f32.mrf.mxu1 }
 0x14f   : > { %v2541_v35 = vpop.f32.mrf.mxu0 }
 0x150   : > { %v2236_v36 = vpop.f32.mrf.mxu1 }
 0x151   : > { %v3796_v38 = vpop.f32.mrf.mxu0 }
 0x152   : > { %v3778_v16 = vpop.f32.mrf.mxu1 }
 0x153   : > { %v4610_v37 = vpop.f32.mrf.mxu0 }
 0x154   : > { %v2239_v41 = vpop.f32.mrf.mxu1 }
 0x15b   : > { %v4612_v43 = vpop.f32.mrf.mxu0 }
 0x15c   : > { %v3781_v39 = vpop.f32.mrf.mxu1 }
 0x15d   : > { %v4614_v47 = vpop.f32.mrf.mxu0 }
 0x15e   : > { %v2252_v23 = vpop.f32.mrf.mxu1 }
 0x15f   : > { %v4616_v42 = vpop.f32.mrf.mxu0 }
 0x160   : > { %v4618_v51 = vpop.f32.mrf.mxu1 }
 0x161   : > { %v4620_v44 = vpop.f32.mrf.mxu0 }
 0x162   : > { %4817 = vst [vmem:[#allocation15_spill] sm:$0xff] %v4620_v44  ;;  %v4622_v54 = vpop.f32.mrf.mxu1  ;;  %v1852_v44 = vadd.f32 %v3759_v56, %v1547_v25  ;;  %v1856_v25 = vadd.f32 %v4566_v1, %v1551_v57 }
 0x164   : > { %v2301_v19 = vadd.f32 %v3777_v33, %v1852_v44 }
 0x168   : > { %v4624_v29 = vpop.f32.mrf.mxu0 }
 0x169   : > { %4818 = vst [vmem:[#allocation16_spill] sm:$0xff] %v4624_v29  ;;  %v4626_v26 = vpop.f32.mrf.mxu1 }
 0x16a   : > { %v4628_v30 = vpop.f32.mrf.mxu0 }
 0x16b   : > { %4819 = vst [vmem:[#allocation17_spill] sm:$0xff] %v4628_v30  ;;  %v4630_v53 = vpop.f32.mrf.mxu1  ;;  %v1548_v30 = vadd.f32 %v3742_v62, %v4534_v0  ;;  %v1549_v0 = vadd.f32 %v1498_v4, %v4540_v14  ;;  %v1550_v4 = vadd.f32 %v4576_v6, %v4544_v22  ;;  %v4682_v22 = vld [vmem:[%s4789_s3] ss:$0 sm:$0xff] }
 0x16c   : > { %4820 = vst [vmem:[#allocation18_spill] sm:$0xff] %v4630_v53  ;;  %v4632_v24 = vpop.f32.mrf.mxu0 }
 0x16d   : > { %4821 = vst [vmem:[#allocation19_spill] sm:$0xff] %v4632_v24  ;;  %v4634_v28 = vpop.f32.mrf.mxu1  ;;  %v1853_v58 = vadd.f32 %v4562_v60, %v1548_v30  ;;  %v1854_v14 = vadd.f32 %v4568_v2, %v1549_v0  ;;  %v1555_v2 = vadd.f32 %v4580_v10, %v4546_v27  ;;  %v1855_v57 = vadd.f32 %v4574_v17, %v1550_v4 }
 0x16e   : > { %4822 = vst [vmem:[#allocation20_spill] sm:$0xff] %v4634_v28  ;;  %v4636_v52 = vpop.f32.mrf.mxu0  ;;  %v1850_v28 = vadd.f32 %v1787_v46, %v1545_v49  ;;  %v2606_v46 = vadd.f32 %v3795_v32, %v2301_v19 }
 0x16f   : > { %4823 = vst [vmem:[#allocation21_spill] sm:$0xff] %v4636_v52  ;;  %v4638_v11 = vpop.f32.mrf.mxu1  ;;  %v1546_v52 = vadd.f32 %v1485_v63, %v4536_v3  ;;  %v2302_v3 = vadd.f32 %v3778_v16, %v1853_v58 }
 0x170   : > { %4824 = vst [vmem:[#allocation22_spill] sm:$0xff] %v4638_v11  ;;  %v2299_v59 = vadd.f32 %v2236_v36, %v1850_v28  ;;  %v2303_v36 = vadd.f32 %v2252_v23, %v1854_v14 }
 0x171   : > { %v1851_v49 = vadd.f32 %v4564_v48, %v1546_v52  ;;  %v2305_v52 = vadd.f32 %v3781_v39, %v1856_v25  ;;  %v4673_v48 = vld [vmem:[%s4788_s2] ss:$0 sm:$0xff]  ;;  %v2607_v19 = vadd.f32 %v3796_v38, %v2302_v3 }
 0x172   : > { %v2604_v60 = vadd.f32 %v2541_v35, %v2299_v59  ;;  %v1857_v35 = vadd.f32 %v4570_v50, %v1552_v9  ;;  %v1553_v50 = vadd.f32 %v4584_v12, %v4548_v31  ;;  %v1860_v31 = vadd.f32 %v4578_v7, %v1555_v2 }
 0x173   : > { %v2300_v28 = vadd.f32 %v2239_v41, %v1851_v49  ;;  %v2610_v27 = vadd.f32 %v4612_v43, %v2305_v52  ;;  %v1556_v12 = vadd.f32 %v4588_v21, %v4550_v34  ;;  %v2608_v43 = vadd.f32 %v4614_v47, %v2303_v36  ;;  %v4830_v36 = vld [vmem:[#allocation10_spill] sm:$0xff] }
 0x174   : > { %v2306_v10 = vadd.f32 %v4618_v51, %v1857_v35  ;;  %v2304_v51 = vadd.f32 %v4622_v54, %v1855_v57  ;;  %v1554_v7 = vadd.f32 %v4592_v20, %v4552_v13  ;;  %v2309_v21 = vadd.f32 %v4626_v26, %v1860_v31  ;;  %v4826_v13 = vld [vmem:[#allocation15_spill] sm:$0xff]  ;;  %v4828_v35 = vld [vmem:[#allocation6_spill] sm:$0xff] }
 0x175   : > { %v2605_v16 = vadd.f32 %v4610_v37, %v2300_v28  ;;  %v1861_v14 = vadd.f32 %v4586_v18, %v1556_v12  ;;  %v4829_v18 = vld [vmem:[#allocation3_spill] sm:$0xff] }
 0x176   : > { %v4642_v55 = vpop.f32.mrf.mxu0  ;;  %v2611_v34 = vadd.f32 %v4616_v42, %v2306_v10  ;;  %v2609_v20 = vadd.f32 %v4826_v13, %v2304_v51  ;;  %v4827_v42 = vld [vmem:[#allocation18_spill] sm:$0xff]  ;;  %v1859_v2 = vadd.f32 %v4828_v35, %v1554_v7  ;;  %v4839_v7 = vld [vmem:[#allocation5_spill] sm:$0xff]  ;;  %v4842_v13 = vld [vmem:[#allocation11_spill] sm:$0xff] }
 0x177   : > { %v4644_v29 = vpop.f32.mrf.mxu1  ;;  %v4837_v12 = vld [vmem:[#allocation22_spill] sm:$0xff]  ;;  %v4844_v35 = vld [vmem:[#allocation13_spill] sm:$0xff] }
 0x178   : > { %v4647_v53 = vpop.f32.mrf.mxu0 }
 0x179   : > { %v4649_v24 = vpop.f32.mrf.mxu1 }
 0x17a   : > { %v4652_v11 = vpop.f32.mrf.mxu0 }
 0x17b   : > { %v4655_v61 = vpop.f32.mrf.mxu1 }
 0x17c   : > { %v4658_v56 = vpop.f32.mrf.mxu0 }
 0x17d   : > { %v4661_v62 = vpop.f32.mrf.mxu1 }
 0x17e   : > { %v3831_v63 = vpop.f32.mrf.mxu0 }
 0x17f   : > { %v3813_v40 = vpop.f32.mrf.mxu1 }
 0x180   : > { %v3007_v30 = vadd.f32 %v3813_v40, %v2606_v46  ;;  %v3172_v33 = vpop.f32.mrf.mxu0  ;;  %v1858_v40 = vadd.f32 %v4582_v5, %v1553_v50  ;;  %v4825_v5 = vld [vmem:[#allocation8_spill] sm:$0xff] }
 0x181   : > { %v2942_v1 = vpop.f32.mrf.mxu1  ;;  %v1559_v4 = vadd.f32 %v4825_v5, %v4554_v45  ;;  %v4831_v45 = vld [vmem:[#allocation16_spill] sm:$0xff] }
 0x182   : > { %v3237_v8 = vadd.f32 %v3831_v63, %v3007_v30  ;;  %v3005_v15 = vadd.f32 %v2942_v1, %v2604_v60  ;;  %v3832_v32 = vpop.f32.mrf.mxu0  ;;  %v2307_v52 = vadd.f32 %v4827_v42, %v1858_v40  ;;  %v4843_v42 = vld [vmem:[#allocation21_spill] sm:$0xff] }
 0x183   : > { %v3814_v6 = vpop.f32.mrf.mxu1 }
 0x184   : > { %v3292_v38 = vmul.f32 %v4673_v48, %v3237_v8  ;;  %v3235_v41 = vadd.f32 %v3172_v33, %v3005_v15  ;;  %v3008_v39 = vadd.f32 %v3814_v6, %v2607_v19  ;;  %v3175_v44 = vpop.f32.mrf.mxu0  ;;  %v1557_v6 = vadd.f32 %v4830_v36, %v4829_v18 }
 0x185   : > { %v2945_v37 = vpop.f32.mrf.mxu1 }
 0x186   : > { %v3315_v23 = vadd.f32 %v4682_v22, %v3292_v38  ;;  %v3290_v58 = vmul.f32 %v4673_v48, %v3235_v41  ;;  %v3238_v59 = vadd.f32 %v3832_v32, %v3008_v39  ;;  %v3006_v17 = vadd.f32 %v2945_v37, %v2605_v16  ;;  %v3835_v0 = vpop.f32.mrf.mxu0  ;;  %v4832_v38 = vld [vmem:[#allocation20_spill] sm:$0xff]  ;;  %v4833_v37 = vld [vmem:[#allocation7_spill] sm:$0xff] }
 0x187   : > { %v3817_v49 = vpop.f32.mrf.mxu1  ;;  %v2614_v16 = vadd.f32 %v4831_v45, %v2309_v21  ;;  %v2310_v41 = vadd.f32 %v4832_v38, %v1861_v14 }
 0x188   : > { %3331 = vst [vmem:[%s4694_s22 + $0x10] sm:$0xff] %v3315_v23  ;;  %v3313_v46 = vadd.f32 %v4682_v22, %v3290_v58  ;;  %v3293_v3 = vmul.f32 %v4673_v48, %v3238_v59  ;;  %v3236_v63 = vadd.f32 %v3175_v44, %v3006_v17  ;;  %v3011_v25 = vadd.f32 %v3817_v49, %v2610_v27  ;;  %v3188_v9 = vpop.f32.mrf.mxu0  ;;  %v4834_v58 = vld [vmem:[#allocation4_spill] sm:$0xff] }
 0x189   : > { %v2958_v47 = vpop.f32.mrf.mxu1  ;;  %v1864_v23 = vadd.f32 %v4833_v37, %v1559_v4  ;;  %v4835_v59 = vld [vmem:[#allocation12_spill] sm:$0xff] }
 0x18a   : > { %3329 = vst [vmem:[%s4694_s22] sm:$0xff] %v3313_v46  ;;  %v3316_v54 = vadd.f32 %v4682_v22, %v3293_v3  ;;  %v3291_v60 = vmul.f32 %v4673_v48, %v3236_v63  ;;  %v3241_v28 = vadd.f32 %v3835_v0, %v3011_v25  ;;  %v3009_v30 = vadd.f32 %v2958_v47, %v2608_v43  ;;  %v3836_v33 = vpop.f32.mrf.mxu0  ;;  %v4836_v0 = vld [vmem:[#allocation17_spill] sm:$0xff]  ;;  %v4841_v47 = vld [vmem:[#allocation19_spill] sm:$0xff] }
 0x18b   : > { %v3818_v26 = vpop.f32.mrf.mxu1  ;;  %v1560_v17 = vadd.f32 %v4835_v59, %v4834_v58  ;;  %v2612_v31 = vadd.f32 %v4836_v0, %v2307_v52  ;;  %v2308_v43 = vadd.f32 %v4837_v12, %v1859_v2 }
 0x18c   : > { %3332 = vst [vmem:[%s4694_s22 + $0x18] sm:$0xff] %v3316_v54  ;;  %v3314_v1 = vadd.f32 %v4682_v22, %v3291_v60  ;;  %v3296_v19 = vmul.f32 %v4673_v48, %v3241_v28  ;;  %v3239_v8 = vadd.f32 %v3188_v9, %v3009_v30  ;;  %v3012_v15 = vadd.f32 %v3818_v26, %v2611_v34  ;;  %v3191_v32 = vpop.f32.mrf.mxu0  ;;  %v4838_v9 = vld [vmem:[#allocation9_spill] sm:$0xff]  ;;  %v4840_v34 = vld [vmem:[#allocation14_spill] sm:$0xff] }
 0x18d   : > { %v2961_v39 = vpop.f32.mrf.mxu1  ;;  %v1862_v40 = vadd.f32 %v4838_v9, %v1557_v6  ;;  %v1558_v21 = vadd.f32 %v4840_v34, %v4839_v7  ;;  %v2615_v54 = vadd.f32 %v4841_v47, %v2310_v41  ;;  %v2313_v60 = vadd.f32 %v4644_v29, %v1864_v23 }
 0x18e   : > { %3330 = vst [vmem:[%s4694_s22 + $0x8] sm:$0xff] %v3314_v1  ;;  %v3319_v44 = vadd.f32 %v4682_v22, %v3296_v19  ;;  %v3294_v57 = vmul.f32 %v4673_v48, %v3239_v8  ;;  %v3242_v50 = vadd.f32 %v3836_v33, %v3012_v15  ;;  %v3010_v27 = vadd.f32 %v2961_v39, %v2609_v20  ;;  %v3839_v10 = vpop.f32.mrf.mxu0 }
 0x18f   : > { %v3821_v51 = vpop.f32.mrf.mxu1  ;;  %v1865_v20 = vadd.f32 %v4842_v13, %v1560_v17  ;;  %v2613_v52 = vadd.f32 %v4843_v42, %v2308_v43  ;;  %v2311_v26 = vadd.f32 %v4649_v24, %v1862_v40  ;;  %v1863_v2 = vadd.f32 %v4844_v35, %v1558_v21 }
 0x190   : > { %3335 = vst [vmem:[%s4694_s22 + $0x30] sm:$0xff] %v3319_v44  ;;  %v3317_v49 = vadd.f32 %v4682_v22, %v3294_v57  ;;  %v3297_v46 = vmul.f32 %v4673_v48, %v3242_v50  ;;  %v3240_v3 = vadd.f32 %v3191_v32, %v3010_v27  ;;  %v3015_v63 = vadd.f32 %v3821_v51, %v2614_v16  ;;  %v3204_v25 = vpop.f32.mrf.mxu0 }
 0x191   : > { %v2974_v28 = vpop.f32.mrf.mxu1  ;;  %v2618_v18 = vadd.f32 %v4642_v55, %v2313_v60  ;;  %v2314_v36 = vadd.f32 %v4655_v61, %v1865_v20  ;;  %v2616_v39 = vadd.f32 %v4647_v53, %v2311_v26  ;;  %v2312_v44 = vadd.f32 %v4661_v62, %v1863_v2 }
 0x192   : > { %3333 = vst [vmem:[%s4694_s22 + $0x20] sm:$0xff] %v3317_v49  ;;  %v3320_v30 = vadd.f32 %v4682_v22, %v3297_v46  ;;  %v3295_v33 = vmul.f32 %v4673_v48, %v3240_v3  ;;  %v3245_v14 = vadd.f32 %v3839_v10, %v3015_v63  ;;  %v3013_v5 = vadd.f32 %v2974_v28, %v2612_v31  ;;  %v3840_v4 = vpop.f32.mrf.mxu0 }
 0x193   : > { %v3822_v1 = vpop.f32.mrf.mxu1  ;;  %v2619_v37 = vadd.f32 %v4652_v11, %v2314_v36  ;;  %v2617_v17 = vadd.f32 %v4658_v56, %v2312_v44 }
 0x194   : > { %3336 = vst [vmem:[%s4694_s22 + $0x38] sm:$0xff] %v3320_v30  ;;  %v3318_v29 = vadd.f32 %v4682_v22, %v3295_v33  ;;  %v3300_v19 = vmul.f32 %v4673_v48, %v3245_v14  ;;  %v3243_v8 = vadd.f32 %v3204_v25, %v3013_v5  ;;  %v3016_v15 = vadd.f32 %v3822_v1, %v2615_v54  ;;  %v3207_v32 = vpop.f32.mrf.mxu0 }
 0x195   : > { %v2977_v6 = vpop.f32.mrf.mxu1 }
 0x196   : > { %3334 = vst [vmem:[%s4694_s22 + $0x28] sm:$0xff] %v3318_v29  ;;  %v3323_v24 = vadd.f32 %v4682_v22, %v3300_v19  ;;  %v3298_v45 = vmul.f32 %v4673_v48, %v3243_v8  ;;  %v3246_v16 = vadd.f32 %v3840_v4, %v3016_v15  ;;  %v3014_v38 = vadd.f32 %v2977_v6, %v2613_v52  ;;  %v3843_v41 = vpop.f32.mrf.mxu0 }
 0x197   : > { %v3825_v57 = vpop.f32.mrf.mxu1 }
 0x198   : > { %3339 = vst [vmem:[%s4694_s22 + $0x50] sm:$0xff] %v3323_v24  ;;  %v3321_v55 = vadd.f32 %v4682_v22, %v3298_v45  ;;  %v3301_v61 = vmul.f32 %v4673_v48, %v3246_v16  ;;  %v3244_v50 = vadd.f32 %v3207_v32, %v3014_v38  ;;  %v3019_v27 = vadd.f32 %v3825_v57, %v2618_v18  ;;  %v3220_v10 = vpop.f32.mrf.mxu0 }
 0x199   : > { %v2990_v23 = vpop.f32.mrf.mxu1 }
 0x19a   : > { %3337 = vst [vmem:[%s4694_s22 + $0x40] sm:$0xff] %v3321_v55  ;;  %v3324_v58 = vadd.f32 %v4682_v22, %v3301_v61  ;;  %v3299_v53 = vmul.f32 %v4673_v48, %v3244_v50  ;;  %v3249_v62 = vadd.f32 %v3843_v41, %v3019_v27  ;;  %v3017_v59 = vadd.f32 %v2990_v23, %v2616_v39  ;;  %v3844_v31 = vpop.f32.mrf.mxu0 }
 0x19b   : > { %v3826_v0 = vpop.f32.mrf.mxu1 }
 0x19c   : > { %3340 = vst [vmem:[%s4694_s22 + $0x58] sm:$0xff] %v3324_v58  ;;  %v3322_v12 = vadd.f32 %v4682_v22, %v3299_v53  ;;  %v3304_v11 = vmul.f32 %v4673_v48, %v3249_v62  ;;  %v3247_v43 = vadd.f32 %v3220_v10, %v3017_v59  ;;  %v3020_v51 = vadd.f32 %v3826_v0, %v2619_v37  ;;  %v3223_v25 = vpop.f32.mrf.mxu0 }
 0x19d   : > { %v2993_v49 = vpop.f32.mrf.mxu1 }
 0x19e   : > { %3338 = vst [vmem:[%s4694_s22 + $0x48] sm:$0xff] %v3322_v12  ;;  %v3327_v46 = vadd.f32 %v4682_v22, %v3304_v11  ;;  %v3302_v3 = vmul.f32 %v4673_v48, %v3247_v43  ;;  %v3250_v63 = vadd.f32 %v3844_v31, %v3020_v51  ;;  %v3018_v56 = vadd.f32 %v2993_v49, %v2617_v17 }
 0x1a0   : > { %3343 = vst [vmem:[%s4694_s22 + $0x70] sm:$0xff] %v3327_v46  ;;  %v3325_v9 = vadd.f32 %v4682_v22, %v3302_v3  ;;  %v3305_v40 = vmul.f32 %v4673_v48, %v3250_v63  ;;  %v3248_v7 = vadd.f32 %v3223_v25, %v3018_v56 }
 0x1a2   : > { %3341 = vst [vmem:[%s4694_s22 + $0x60] sm:$0xff] %v3325_v9  ;;  %v3328_v34 = vadd.f32 %v4682_v22, %v3305_v40  ;;  %v3303_v21 = vmul.f32 %v4673_v48, %v3248_v7 }
 0x1a4   : > { %3344 = vst [vmem:[%s4694_s22 + $0x78] sm:$0xff] %v3328_v34  ;;  %v3326_v47 = vadd.f32 %v4682_v22, %v3303_v21 }
 0x1a6   : > { %3342 = vst [vmem:[%s4694_s22 + $0x68] sm:$0xff] %v3326_v47 }
 0x1a7 PF: > { %s14_s15 = sadd.s32 1, %s3888_s15  }
 0x1a8   : > { %p11_p4 = scmp.ge.s32.totalorder %s14_s15, 6  }
 0x1aa   :  { %13 = sbr.rel (!%p11_p4) target bundleno = 1 (0x1), region = 74 }

</bundles_post_ra>
